<compile_context>
chip_gen: v6e
topology: v6e:2x2x1
jax: 0.10.0
libtpu: 0.0.40
codegen_flags: <defaults>
</compile_context>

<pallas_src>
import math

import jax
import jax.numpy as jnp
from jax.experimental import pallas as pl
from jax.experimental.pallas import tpu as pltpu

_BN_EPS = 1e-5


# ----------------------------------------------------------------------------
# Fused [ChebConv -> (BN | +bias) -> ReLU] x N_stages kernel (one Laplacian)
# ----------------------------------------------------------------------------
def _make_group_kernel(B, V, K, stage_cfg, eps=_BN_EPS):
    """stage_cfg: tuple of (fin, fout, has_bn) applied back-to-back with one L^T.

    Ref order: x2d, lap_t, then per stage: w, (gamma, beta) if BN else (bias,),
    finally the output ref.  All activations are [B*C, V] with V on lanes.
    """
    inv_bv = 1.0 / float(B * V)

    def kernel(*refs):
        refs = list(refs)
        x_ref = refs.pop(0)
        lt_ref = refs.pop(0)
        o_ref = refs.pop()                        # single output, no scratch
        lt = lt_ref[...]                          # [V, V] bf16, loaded ONCE per launch
        x = x_ref[...].astype(jnp.float32)        # [B*Fin0, V]

        for (fin, fout, has_bn) in stage_cfg:
            w_ref = refs.pop(0)                   # [K, Fout, Fin] f32 (quirk folded)
            if has_bn:
                g_ref = refs.pop(0)
                be_ref = refs.pop(0)
            else:
                bias_ref = refs.pop(0)

            # ---- order-K Chebyshev recursion: bf16 MXU operands, f32 carries ----
            xs = [x]
            if K > 1:
                x1 = jnp.dot(x.astype(lt.dtype), lt,
                             preferred_element_type=jnp.float32)
                xs.append(x1)
                xm2, xm1 = x, x1
                for _ in range(2, K):              # K tiny & static -> unrolled
                    xk = 2.0 * jnp.dot(xm1.astype(lt.dtype), lt,
                                       preferred_element_type=jnp.float32) - xm2
                    xs.append(xk)
                    xm2, xm1 = xm1, xk

            # ---- weight contraction: unrolled loop over B (no kron(I_B, W)) ----
            outs = []
            for b in range(B):
                acc = jnp.dot(w_ref[0], xs[0][b * fin:(b + 1) * fin, :],
                              preferred_element_type=jnp.float32)
                for k in range(1, K):
                    acc = acc + jnp.dot(w_ref[k], xs[k][b * fin:(b + 1) * fin, :],
                                        preferred_element_type=jnp.float32)
                outs.append(acc)                   # [Fout, V]
            z = outs[0] if B == 1 else jnp.concatenate(outs, axis=0)   # [B*Fout, V]

            if has_bn:
                # Training-mode BatchNorm1d: lane reductions + tiny batch fold.
                # (conv bias is skipped for BN stages: it cancels exactly)
                s1 = jnp.sum(z, axis=1, keepdims=True)        # [B*Fout, 1]
                s2 = jnp.sum(z * z, axis=1, keepdims=True)
                cs1 = s1[0:fout, :]
                cs2 = s2[0:fout, :]
                for b in range(1, B):
                    cs1 = cs1 + s1[b * fout:(b + 1) * fout, :]
                    cs2 = cs2 + s2[b * fout:(b + 1) * fout, :]
                mean = cs1 * inv_bv                           # E[x] per channel
                var = jnp.maximum(cs2 * inv_bv - mean * mean, 0.0)   # biased, clamped
                scale = g_ref[...] * jax.lax.rsqrt(var + eps)        # rsqrt -> EUP
                shift = be_ref[...] - mean * scale
                if B > 1:
                    scale = jnp.concatenate([scale] * B, axis=0)
                    shift = jnp.concatenate([shift] * B, axis=0)
                z = z * scale + shift
            else:
                bias = bias_ref[...]                          # [Fout, 1]
                if B > 1:
                    bias = jnp.concatenate([bias] * B, axis=0)
                z = z + bias

            x = jnp.maximum(z, 0.0)                           # ReLU ends every stage

        o_ref[...] = x

    return kernel


# ----------------------------------------------------------------------------
# Host-side helpers
# ----------------------------------------------------------------------------
def _effective_weight(w):
    """Fold the PyTorch flattening quirk into the weight.

    `cheb_conv` flattens the activations (Fin, K)-major but views the weight
    (K, Fin)-major, so the coefficient that multiplies T_k(L) x[:, f] is
    w.reshape(Fin, K, Fout)[f, k].  Returns [K, Fout, Fin] ready for W @ x dots.
    """
    K, fin, fout = w.shape
    e = jnp.transpose(jnp.reshape(w.astype(jnp.float32), (fin, K, fout)), (1, 0, 2))
    return jnp.transpose(e, (0, 2, 1))            # [K, Fout, Fin]


def _stage(w, bias=None, gamma=None, beta=None):
    K, fin, fout = w.shape
    st = dict(w=_effective_weight(w), fin=fin, fout=fout, K=K,
              has_bn=gamma is not None)
    if gamma is not None:
        st["gamma"] = gamma.astype(jnp.float32).reshape(fout, 1)
        st["beta"] = beta.astype(jnp.float32).reshape(fout, 1)
    else:
        st["bias"] = bias.astype(jnp.float32).reshape(fout, 1)
    return st


def fused_cheb_group(x, lap_t, stages):
    """One pallas_call: [ChebConv -> (BN | +bias) -> ReLU] x len(stages), shared L^T.

    x      : [B, C_in, V]
    lap_t  : [V, V] transposed Laplacian (bf16 for the MXU path)
    stages : list built by _stage(); stage i+1 consumes stage i's output.
    returns [B, Fout_last, V] float32
    """
    B, c_in, V = x.shape
    assert lap_t.shape == (V, V)
    K = stages[0]["K"]
    assert stages[0]["fin"] == c_in
    for a, b in zip(stages[:-1], stages[1:]):
        assert b["fin"] == a["fout"] and b["K"] == K

    args = [x.astype(jnp.float32).reshape(B * c_in, V), lap_t]
    cfg = []
    for s in stages:
        args.append(s["w"])
        if s["has_bn"]:
            args += [s["gamma"], s["beta"]]
        else:
            args.append(s["bias"])
        cfg.append((s["fin"], s["fout"], s["has_bn"]))
    fout_last = cfg[-1][1]
    out_shape = jax.ShapeDtypeStruct((B * fout_last, V), jnp.float32)

    # Advisory cost estimate + VMEM sizing (single-shot operands, no pipelining,
    # so nothing should be double-buffered and the scoped limit is set explicitly).
    flops = 0
    transc = 0
    for fin, fout, has_bn in cfg:
        flops += 2 * (K - 1) * (B * fin) * V * V       # Chebyshev recursion dots
        flops += 2 * K * B * fout * fin * V            # weight contraction
        flops += 8 * B * fout * V                      # BN / bias + ReLU tail
        if has_bn:
            transc += fout                             # rsqrt per channel
    nbytes = sum(int(a.size) * a.dtype.itemsize for a in args)
    nbytes += math.prod(out_shape.shape) * out_shape.dtype.itemsize
    vmem_limit = int(min(128 * 1024 * 1024, max(4 << 20, 2 * nbytes + (4 << 20))))

    vmem_spec = pl.BlockSpec(memory_space=pltpu.MemorySpace.VMEM)
    out = pl.pallas_call(
        _make_group_kernel(B, V, K, tuple(cfg)),
        out_shape=out_shape,
        in_specs=[vmem_spec] * len(args),
        out_specs=vmem_spec,
        compiler_params=pltpu.CompilerParams(vmem_limit_bytes=vmem_limit),
        cost_estimate=pl.CostEstimate(flops=int(flops), transcendentals=int(transc),
                                      bytes_accessed=int(nbytes)),
    )(*args)
    return out.reshape(B, fout_last, V)


# ----------------------------------------------------------------------------
# Decoder forward (mirrors the PyTorch module structure)
# ----------------------------------------------------------------------------
def decoder_forward(params, laps, x, encoder_features):
    # Transposed dense Laplacians, bf16 on the MXU path (f32 accumulation in-kernel).
    lts = [jnp.asarray(l, jnp.float32).T.astype(jnp.bfloat16) for l in laps]
    blocks = params["blocks"]
    nb = len(blocks)

    def block_stages(bp):
        return [_stage(bp["w1"], gamma=bp["g1"], beta=bp["be1"]),
                _stage(bp["w2"], gamma=bp["g2"], beta=bp["be2"])]

    h = fused_cheb_group(x, lts[0], block_stages(blocks[0]))
    for i in range(1, nb):
        # Nearest-neighbour unpool + encoder skip concat (decoder channels first),
        # as a free lane repeat instead of a dense 0/1 unpool matmul.
        # TODO(synk): PyTorch injects the `unpooling` operator externally;
        #   nearest-neighbour x4 upsampling is assumed here.
        rep = lts[i].shape[0] // h.shape[-1]
        if rep > 1:
            h = jnp.repeat(h, rep, axis=-1)
        h = jnp.concatenate([h, encoder_features[-i]], axis=1)
        stages = block_stages(blocks[i])
        if i == nb - 1:                           # fold the head into the last launch
            stages.append(_stage(params["head_w"], bias=params["head_b"]))
        h = fused_cheb_group(h, lts[i], stages)
    return h


# ----------------------------------------------------------------------------
# Pure-JAX reference (mirrors the PyTorch code) for a correctness check
# ----------------------------------------------------------------------------
def _ref_cheb_conv(L, x, w, b):
    B, Fin, V = x.shape
    K, _, Fout = w.shape
    x0 = jnp.transpose(x, (2, 1, 0)).reshape(V, Fin * B)
    xs = [x0]
    if K > 1:
        x1 = L @ x0
        xs.append(x1)
        xm2, xm1 = x0, x1
        for _ in range(2, K):
            x2 = 2.0 * (L @ xm1) - xm2
            xs.append(x2)
            xm2, xm1 = xm1, x2
    s = jnp.stack(xs, 0).reshape(K, V, Fin, B)
    s = jnp.transpose(s, (3, 1, 2, 0)).reshape(B * V, Fin * K)
    out = s @ w.reshape(Fin * K, Fout) + b[None, :]   # same (Fin,K)/(K,Fin) view quirk
    return jnp.transpose(out.reshape(B, V, Fout), (0, 2, 1))


def _ref_bn_relu(x, g, be):
    mean = jnp.mean(x, axis=(0, 2), keepdims=True)
    var = jnp.mean((x - mean) ** 2, axis=(0, 2), keepdims=True)
    y = (x - mean) * jax.lax.rsqrt(var + _BN_EPS) * g[None, :, None] + be[None, :, None]
    return jnp.maximum(y, 0.0)


def _ref_decoder(params, laps, x, encoder_features):
    def blk(p, L, h):
        h = _ref_bn_relu(_ref_cheb_conv(L, h, p["w1"], p["b1"]), p["g1"], p["be1"])
        h = _ref_bn_relu(_ref_cheb_conv(L, h, p["w2"], p["b2"]), p["g2"], p["be2"])
        return h

    blocks = params["blocks"]
    h = blk(blocks[0], laps[0], x)
    for i in range(1, len(blocks)):
        rep = laps[i].shape[0] // h.shape[-1]
        h = jnp.repeat(h, rep, axis=-1)
        h = jnp.concatenate([h, encoder_features[-i]], axis=1)
        h = blk(blocks[i], laps[i], h)
    h = _ref_cheb_conv(laps[-1], h, params["head_w"], params["head_b"])
    return jnp.maximum(h, 0.0)


def init_cheb(key, K, fin, fout):
    std = math.sqrt(2.0 / (fin * K))                        # kaiming init
    w = jax.random.normal(key, (K, fin, fout), jnp.float32) * std
    b = jnp.full((fout,), 0.01, jnp.float32)                # bias init = 0.01
    return w, b


# ----------------------------------------------------------------------------
# Main
# ----------------------------------------------------------------------------
if __name__ == "__main__":
    key = jax.random.PRNGKey(0)
    keys = iter(jax.random.split(key, 64))

    B = 2
    filter_start = 4
    out_channels = 3
    kernel_size = 3
    D = 3                                   # number of laplacians (> 1)
    Vs = [8, 32, 128]                       # increasing resolutions, x4 per level
    f = filter_start

    # deterministic dense symmetric "laplacians" (stand-ins for sparse ones)
    laps = []
    for V in Vs:
        A = jax.random.normal(next(keys), (V, V), jnp.float32) * 0.1
        laps.append((A + A.T) / 2.0)

    # channel configuration exactly as Decoder.__init__
    block_cfg = [(2 ** (D - 2) * f, 2 ** (D - 1) * f, 2 ** (D - 2) * f)]
    block_cfg += [(2 ** (D - i) * f, 2 ** (D - i - 1) * f, 2 ** (D - i - 2) * f)
                  for i in range(1, D - 1)]
    block_cfg += [(2 * f, f, f)]

    blocks = []
    for (cin, cint, cout) in block_cfg:
        w1, b1 = init_cheb(next(keys), kernel_size, cin, cint)
        w2, b2 = init_cheb(next(keys), kernel_size, cint, cout)
        blocks.append(dict(
            w1=w1, b1=b1,
            g1=jax.random.uniform(next(keys), (cint,), jnp.float32, 0.5, 1.5),
            be1=0.1 * jax.random.normal(next(keys), (cint,), jnp.float32),
            w2=w2, b2=b2,
            g2=jax.random.uniform(next(keys), (cout,), jnp.float32, 0.5, 1.5),
            be2=0.1 * jax.random.normal(next(keys), (cout,), jnp.float32),
        ))
    head_w, head_b = init_cheb(next(keys), kernel_size, f, out_channels)
    params = dict(blocks=blocks, head_w=head_w, head_b=head_b)

    # inputs: x is [B, 2^(D-2)*f, V_coarsest]; encoder features per docstring
    x = jax.random.normal(next(keys), (B, 2 ** (D - 2) * f, Vs[0]), jnp.float32)
    encoder_features = [
        jax.random.normal(next(keys), (B, f, Vs[2]), jnp.float32),      # finest
        jax.random.normal(next(keys), (B, 2 * f, Vs[1]), jnp.float32),  # mid
    ]

    out = jax.jit(decoder_forward)(params, laps, x, encoder_features)
    out = jax.block_until_ready(out)
    assert out.shape == (B, out_channels, Vs[-1]), out.shape
    assert bool(jnp.all(jnp.isfinite(out)))

    # correctness check vs the pure-JAX f32 reference.  The kernel runs the
    # Laplacian-recursion dots with bf16 MXU operands (f32 accumulation and
    # carries), so a few-percent worst-case deviation is expected.
    ref = _ref_decoder(params, laps, x, encoder_features)
    scale = 1.0 + float(jnp.max(jnp.abs(ref)))
    err = float(jnp.max(jnp.abs(out - ref)))
    assert err <= 8e-2 * scale, (err, scale)

    print("KERNEL_OK")
</pallas_src>

<mosaic_0001>
module attributes {stable_mosaic.version = 11 : i64} {
  func.func @kernel(%arg0: memref<16x8xf32, #tpu.memory_space<vmem>>, %arg1: memref<8x8xbf16, #tpu.memory_space<vmem>>, %arg2: memref<3x16x8xf32, #tpu.memory_space<vmem>>, %arg3: memref<16x1xf32, #tpu.memory_space<vmem>>, %arg4: memref<16x1xf32, #tpu.memory_space<vmem>>, %arg5: memref<3x8x16xf32, #tpu.memory_space<vmem>>, %arg6: memref<8x1xf32, #tpu.memory_space<vmem>>, %arg7: memref<8x1xf32, #tpu.memory_space<vmem>>, %arg8: memref<16x8xf32, #tpu.memory_space<vmem>>) attributes {dimension_semantics = [], scalar_prefetch = 0 : i64, scratch_operands = 0 : i64, tpu.core_type = #tpu.core_type<tc>} {
    %c0 = arith.constant 0 : index
    %c0_0 = arith.constant 0 : index
    %0 = vector.load %arg1[%c0, %c0_0] : memref<8x8xbf16, #tpu.memory_space<vmem>>, vector<8x8xbf16>
    %c0_1 = arith.constant 0 : index
    %c0_2 = arith.constant 0 : index
    %1 = vector.load %arg0[%c0_1, %c0_2] : memref<16x8xf32, #tpu.memory_space<vmem>>, vector<16x8xf32>
    %2 = arith.truncf %1 : vector<16x8xf32> to vector<16x8xbf16>
    %cst = arith.constant dense<0.000000e+00> : vector<16x8xf32>
    %3 = tpu.matmul %2, %0, %cst {dimension_numbers = #tpu.dot_dimension_numbers<[1], [0], [0], [1], [0, 0, 1, 1], [], []>} : vector<16x8xbf16>, vector<8x8xbf16>, vector<16x8xf32> -> vector<16x8xf32>
    %4 = arith.truncf %3 : vector<16x8xf32> to vector<16x8xbf16>
    %cst_3 = arith.constant dense<0.000000e+00> : vector<16x8xf32>
    %5 = tpu.matmul %4, %0, %cst_3 {dimension_numbers = #tpu.dot_dimension_numbers<[1], [0], [0], [1], [0, 0, 1, 1], [], []>} : vector<16x8xbf16>, vector<8x8xbf16>, vector<16x8xf32> -> vector<16x8xf32>
    %cst_4 = arith.constant 2.000000e+00 : f32
    %6 = vector.broadcast %cst_4 : f32 to vector<16x8xf32>
    %7 = arith.mulf %6, %5 : vector<16x8xf32>
    %8 = arith.subf %7, %1 : vector<16x8xf32>
    %c0_5 = arith.constant 0 : index
    %c0_6 = arith.constant 0 : index
    %c0_7 = arith.constant 0 : index
    %9 = vector.load %arg2[%c0_5, %c0_6, %c0_7] : memref<3x16x8xf32, #tpu.memory_space<vmem>>, vector<1x16x8xf32>
    %10 = vector.shape_cast %9 : vector<1x16x8xf32> to vector<16x8xf32>
    %11 = vector.extract_strided_slice %1 {offsets = [0, 0], sizes = [8, 8], strides = [1, 1]} : vector<16x8xf32> to vector<8x8xf32>
    %cst_8 = arith.constant dense<0.000000e+00> : vector<16x8xf32>
    %12 = tpu.matmul %10, %11, %cst_8 {dimension_numbers = #tpu.dot_dimension_numbers<[1], [0], [0], [1], [0, 0, 1, 1], [], []>} : vector<16x8xf32>, vector<8x8xf32>, vector<16x8xf32> -> vector<16x8xf32>
    %c1 = arith.constant 1 : index
    %c0_9 = arith.constant 0 : index
    %c0_10 = arith.constant 0 : index
    %13 = vector.load %arg2[%c1, %c0_9, %c0_10] : memref<3x16x8xf32, #tpu.memory_space<vmem>>, vector<1x16x8xf32>
    %14 = vector.shape_cast %13 : vector<1x16x8xf32> to vector<16x8xf32>
    %15 = vector.extract_strided_slice %3 {offsets = [0, 0], sizes = [8, 8], strides = [1, 1]} : vector<16x8xf32> to vector<8x8xf32>
    %cst_11 = arith.constant dense<0.000000e+00> : vector<16x8xf32>
    %16 = tpu.matmul %14, %15, %cst_11 {dimension_numbers = #tpu.dot_dimension_numbers<[1], [0], [0], [1], [0, 0, 1, 1], [], []>} : vector<16x8xf32>, vector<8x8xf32>, vector<16x8xf32> -> vector<16x8xf32>
    %17 = arith.addf %12, %16 : vector<16x8xf32>
    %c2 = arith.constant 2 : index
    %c0_12 = arith.constant 0 : index
    %c0_13 = arith.constant 0 : index
    %18 = vector.load %arg2[%c2, %c0_12, %c0_13] : memref<3x16x8xf32, #tpu.memory_space<vmem>>, vector<1x16x8xf32>
    %19 = vector.shape_cast %18 : vector<1x16x8xf32> to vector<16x8xf32>
    %20 = vector.extract_strided_slice %8 {offsets = [0, 0], sizes = [8, 8], strides = [1, 1]} : vector<16x8xf32> to vector<8x8xf32>
    %cst_14 = arith.constant dense<0.000000e+00> : vector<16x8xf32>
    %21 = tpu.matmul %19, %20, %cst_14 {dimension_numbers = #tpu.dot_dimension_numbers<[1], [0], [0], [1], [0, 0, 1, 1], [], []>} : vector<16x8xf32>, vector<8x8xf32>, vector<16x8xf32> -> vector<16x8xf32>
    %22 = arith.addf %17, %21 : vector<16x8xf32>
    %c0_15 = arith.constant 0 : index
    %c0_16 = arith.constant 0 : index
    %c0_17 = arith.constant 0 : index
    %23 = vector.load %arg2[%c0_15, %c0_16, %c0_17] : memref<3x16x8xf32, #tpu.memory_space<vmem>>, vector<1x16x8xf32>
    %24 = vector.shape_cast %23 : vector<1x16x8xf32> to vector<16x8xf32>
    %25 = vector.extract_strided_slice %1 {offsets = [8, 0], sizes = [8, 8], strides = [1, 1]} : vector<16x8xf32> to vector<8x8xf32>
    %cst_18 = arith.constant dense<0.000000e+00> : vector<16x8xf32>
    %26 = tpu.matmul %24, %25, %cst_18 {dimension_numbers = #tpu.dot_dimension_numbers<[1], [0], [0], [1], [0, 0, 1, 1], [], []>} : vector<16x8xf32>, vector<8x8xf32>, vector<16x8xf32> -> vector<16x8xf32>
    %c1_19 = arith.constant 1 : index
    %c0_20 = arith.constant 0 : index
    %c0_21 = arith.constant 0 : index
    %27 = vector.load %arg2[%c1_19, %c0_20, %c0_21] : memref<3x16x8xf32, #tpu.memory_space<vmem>>, vector<1x16x8xf32>
    %28 = vector.shape_cast %27 : vector<1x16x8xf32> to vector<16x8xf32>
    %29 = vector.extract_strided_slice %3 {offsets = [8, 0], sizes = [8, 8], strides = [1, 1]} : vector<16x8xf32> to vector<8x8xf32>
    %cst_22 = arith.constant dense<0.000000e+00> : vector<16x8xf32>
    %30 = tpu.matmul %28, %29, %cst_22 {dimension_numbers = #tpu.dot_dimension_numbers<[1], [0], [0], [1], [0, 0, 1, 1], [], []>} : vector<16x8xf32>, vector<8x8xf32>, vector<16x8xf32> -> vector<16x8xf32>
    %31 = arith.addf %26, %30 : vector<16x8xf32>
    %c2_23 = arith.constant 2 : index
    %c0_24 = arith.constant 0 : index
    %c0_25 = arith.constant 0 : index
    %32 = vector.load %arg2[%c2_23, %c0_24, %c0_25] : memref<3x16x8xf32, #tpu.memory_space<vmem>>, vector<1x16x8xf32>
    %33 = vector.shape_cast %32 : vector<1x16x8xf32> to vector<16x8xf32>
    %34 = vector.extract_strided_slice %8 {offsets = [8, 0], sizes = [8, 8], strides = [1, 1]} : vector<16x8xf32> to vector<8x8xf32>
    %cst_26 = arith.constant dense<0.000000e+00> : vector<16x8xf32>
    %35 = tpu.matmul %33, %34, %cst_26 {dimension_numbers = #tpu.dot_dimension_numbers<[1], [0], [0], [1], [0, 0, 1, 1], [], []>} : vector<16x8xf32>, vector<8x8xf32>, vector<16x8xf32> -> vector<16x8xf32>
    %36 = arith.addf %31, %35 : vector<16x8xf32>
    %37 = tpu.concatenate %22, %36 in 0 : vector<16x8xf32>, vector<16x8xf32> -> vector<32x8xf32>
    %cst_27 = arith.constant dense<0.000000e+00> : vector<32xf32>
    %38 = vector.multi_reduction <add>, %37, %cst_27 [1] : vector<32x8xf32> to vector<32xf32>
    %39 = vector.shape_cast %38 : vector<32xf32> to vector<32x1xf32>
    %40 = arith.mulf %37, %37 : vector<32x8xf32>
    %cst_28 = arith.constant dense<0.000000e+00> : vector<32xf32>
    %41 = vector.multi_reduction <add>, %40, %cst_28 [1] : vector<32x8xf32> to vector<32xf32>
    %42 = vector.shape_cast %41 : vector<32xf32> to vector<32x1xf32>
    %43 = vector.extract_strided_slice %39 {offsets = [0, 0], sizes = [16, 1], strides = [1, 1]} : vector<32x1xf32> to vector<16x1xf32>
    %44 = vector.extract_strided_slice %42 {offsets = [0, 0], sizes = [16, 1], strides = [1, 1]} : vector<32x1xf32> to vector<16x1xf32>
    %45 = vector.extract_strided_slice %39 {offsets = [16, 0], sizes = [16, 1], strides = [1, 1]} : vector<32x1xf32> to vector<16x1xf32>
    %46 = arith.addf %43, %45 : vector<16x1xf32>
    %47 = vector.extract_strided_slice %42 {offsets = [16, 0], sizes = [16, 1], strides = [1, 1]} : vector<32x1xf32> to vector<16x1xf32>
    %48 = arith.addf %44, %47 : vector<16x1xf32>
    %cst_29 = arith.constant 6.250000e-02 : f32
    %49 = vector.broadcast %cst_29 : f32 to vector<16x1xf32>
    %50 = arith.mulf %46, %49 : vector<16x1xf32>
    %cst_30 = arith.constant 6.250000e-02 : f32
    %51 = vector.broadcast %cst_30 : f32 to vector<16x1xf32>
    %52 = arith.mulf %48, %51 : vector<16x1xf32>
    %53 = arith.mulf %50, %50 : vector<16x1xf32>
    %54 = arith.subf %52, %53 : vector<16x1xf32>
    %cst_31 = arith.constant 0.000000e+00 : f32
    %55 = vector.broadcast %cst_31 : f32 to vector<16x1xf32>
    %56 = arith.maximumf %54, %55 : vector<16x1xf32>
    %c0_32 = arith.constant 0 : index
    %c0_33 = arith.constant 0 : index
    %57 = vector.load %arg3[%c0_32, %c0_33] : memref<16x1xf32, #tpu.memory_space<vmem>>, vector<16x1xf32>
    %cst_34 = arith.constant 9.99999974E-6 : f32
    %58 = vector.broadcast %cst_34 : f32 to vector<16x1xf32>
    %59 = arith.addf %56, %58 : vector<16x1xf32>
    %60 = math.rsqrt %59 : vector<16x1xf32>
    %61 = arith.mulf %57, %60 : vector<16x1xf32>
    %c0_35 = arith.constant 0 : index
    %c0_36 = arith.constant 0 : index
    %62 = vector.load %arg4[%c0_35, %c0_36] : memref<16x1xf32, #tpu.memory_space<vmem>>, vector<16x1xf32>
    %63 = arith.mulf %50, %61 : vector<16x1xf32>
    %64 = arith.subf %62, %63 : vector<16x1xf32>
    %65 = tpu.concatenate %61, %61 in 0 : vector<16x1xf32>, vector<16x1xf32> -> vector<32x1xf32>
    %66 = tpu.concatenate %64, %64 in 0 : vector<16x1xf32>, vector<16x1xf32> -> vector<32x1xf32>
    %67 = vector.broadcast %65 : vector<32x1xf32> to vector<32x8xf32>
    %68 = arith.mulf %37, %67 : vector<32x8xf32>
    %69 = vector.broadcast %66 : vector<32x1xf32> to vector<32x8xf32>
    %70 = arith.addf %68, %69 : vector<32x8xf32>
    %cst_37 = arith.constant 0.000000e+00 : f32
    %71 = vector.broadcast %cst_37 : f32 to vector<32x8xf32>
    %72 = arith.maximumf %70, %71 : vector<32x8xf32>
    %73 = arith.truncf %72 : vector<32x8xf32> to vector<32x8xbf16>
    %cst_38 = arith.constant dense<0.000000e+00> : vector<32x8xf32>
    %74 = tpu.matmul %73, %0, %cst_38 {dimension_numbers = #tpu.dot_dimension_numbers<[1], [0], [0], [1], [0, 0, 1, 1], [], []>} : vector<32x8xbf16>, vector<8x8xbf16>, vector<32x8xf32> -> vector<32x8xf32>
    %75 = arith.truncf %74 : vector<32x8xf32> to vector<32x8xbf16>
    %cst_39 = arith.constant dense<0.000000e+00> : vector<32x8xf32>
    %76 = tpu.matmul %75, %0, %cst_39 {dimension_numbers = #tpu.dot_dimension_numbers<[1], [0], [0], [1], [0, 0, 1, 1], [], []>} : vector<32x8xbf16>, vector<8x8xbf16>, vector<32x8xf32> -> vector<32x8xf32>
    %cst_40 = arith.constant 2.000000e+00 : f32
    %77 = vector.broadcast %cst_40 : f32 to vector<32x8xf32>
    %78 = arith.mulf %77, %76 : vector<32x8xf32>
    %79 = arith.subf %78, %72 : vector<32x8xf32>
    %c0_41 = arith.constant 0 : index
    %c0_42 = arith.constant 0 : index
    %c0_43 = arith.constant 0 : index
    %80 = vector.load %arg5[%c0_41, %c0_42, %c0_43] : memref<3x8x16xf32, #tpu.memory_space<vmem>>, vector<1x8x16xf32>
    %81 = vector.shape_cast %80 : vector<1x8x16xf32> to vector<8x16xf32>
    %82 = vector.extract_strided_slice %72 {offsets = [0, 0], sizes = [16, 8], strides = [1, 1]} : vector<32x8xf32> to vector<16x8xf32>
    %cst_44 = arith.constant dense<0.000000e+00> : vector<8x8xf32>
    %83 = tpu.matmul %81, %82, %cst_44 {dimension_numbers = #tpu.dot_dimension_numbers<[1], [0], [0], [1], [0, 0, 1, 1], [], []>} : vector<8x16xf32>, vector<16x8xf32>, vector<8x8xf32> -> vector<8x8xf32>
    %c1_45 = arith.constant 1 : index
    %c0_46 = arith.constant 0 : index
    %c0_47 = arith.constant 0 : index
    %84 = vector.load %arg5[%c1_45, %c0_46, %c0_47] : memref<3x8x16xf32, #tpu.memory_space<vmem>>, vector<1x8x16xf32>
    %85 = vector.shape_cast %84 : vector<1x8x16xf32> to vector<8x16xf32>
    %86 = vector.extract_strided_slice %74 {offsets = [0, 0], sizes = [16, 8], strides = [1, 1]} : vector<32x8xf32> to vector<16x8xf32>
    %cst_48 = arith.constant dense<0.000000e+00> : vector<8x8xf32>
    %87 = tpu.matmul %85, %86, %cst_48 {dimension_numbers = #tpu.dot_dimension_numbers<[1], [0], [0], [1], [0, 0, 1, 1], [], []>} : vector<8x16xf32>, vector<16x8xf32>, vector<8x8xf32> -> vector<8x8xf32>
    %88 = arith.addf %83, %87 : vector<8x8xf32>
    %c2_49 = arith.constant 2 : index
    %c0_50 = arith.constant 0 : index
    %c0_51 = arith.constant 0 : index
    %89 = vector.load %arg5[%c2_49, %c0_50, %c0_51] : memref<3x8x16xf32, #tpu.memory_space<vmem>>, vector<1x8x16xf32>
    %90 = vector.shape_cast %89 : vector<1x8x16xf32> to vector<8x16xf32>
    %91 = vector.extract_strided_slice %79 {offsets = [0, 0], sizes = [16, 8], strides = [1, 1]} : vector<32x8xf32> to vector<16x8xf32>
    %cst_52 = arith.constant dense<0.000000e+00> : vector<8x8xf32>
    %92 = tpu.matmul %90, %91, %cst_52 {dimension_numbers = #tpu.dot_dimension_numbers<[1], [0], [0], [1], [0, 0, 1, 1], [], []>} : vector<8x16xf32>, vector<16x8xf32>, vector<8x8xf32> -> vector<8x8xf32>
    %93 = arith.addf %88, %92 : vector<8x8xf32>
    %c0_53 = arith.constant 0 : index
    %c0_54 = arith.constant 0 : index
    %c0_55 = arith.constant 0 : index
    %94 = vector.load %arg5[%c0_53, %c0_54, %c0_55] : memref<3x8x16xf32, #tpu.memory_space<vmem>>, vector<1x8x16xf32>
    %95 = vector.shape_cast %94 : vector<1x8x16xf32> to vector<8x16xf32>
    %96 = vector.extract_strided_slice %72 {offsets = [16, 0], sizes = [16, 8], strides = [1, 1]} : vector<32x8xf32> to vector<16x8xf32>
    %cst_56 = arith.constant dense<0.000000e+00> : vector<8x8xf32>
    %97 = tpu.matmul %95, %96, %cst_56 {dimension_numbers = #tpu.dot_dimension_numbers<[1], [0], [0], [1], [0, 0, 1, 1], [], []>} : vector<8x16xf32>, vector<16x8xf32>, vector<8x8xf32> -> vector<8x8xf32>
    %c1_57 = arith.constant 1 : index
    %c0_58 = arith.constant 0 : index
    %c0_59 = arith.constant 0 : index
    %98 = vector.load %arg5[%c1_57, %c0_58, %c0_59] : memref<3x8x16xf32, #tpu.memory_space<vmem>>, vector<1x8x16xf32>
    %99 = vector.shape_cast %98 : vector<1x8x16xf32> to vector<8x16xf32>
    %100 = vector.extract_strided_slice %74 {offsets = [16, 0], sizes = [16, 8], strides = [1, 1]} : vector<32x8xf32> to vector<16x8xf32>
    %cst_60 = arith.constant dense<0.000000e+00> : vector<8x8xf32>
    %101 = tpu.matmul %99, %100, %cst_60 {dimension_numbers = #tpu.dot_dimension_numbers<[1], [0], [0], [1], [0, 0, 1, 1], [], []>} : vector<8x16xf32>, vector<16x8xf32>, vector<8x8xf32> -> vector<8x8xf32>
    %102 = arith.addf %97, %101 : vector<8x8xf32>
    %c2_61 = arith.constant 2 : index
    %c0_62 = arith.constant 0 : index
    %c0_63 = arith.constant 0 : index
    %103 = vector.load %arg5[%c2_61, %c0_62, %c0_63] : memref<3x8x16xf32, #tpu.memory_space<vmem>>, vector<1x8x16xf32>
    %104 = vector.shape_cast %103 : vector<1x8x16xf32> to vector<8x16xf32>
    %105 = vector.extract_strided_slice %79 {offsets = [16, 0], sizes = [16, 8], strides = [1, 1]} : vector<32x8xf32> to vector<16x8xf32>
    %cst_64 = arith.constant dense<0.000000e+00> : vector<8x8xf32>
    %106 = tpu.matmul %104, %105, %cst_64 {dimension_numbers = #tpu.dot_dimension_numbers<[1], [0], [0], [1], [0, 0, 1, 1], [], []>} : vector<8x16xf32>, vector<16x8xf32>, vector<8x8xf32> -> vector<8x8xf32>
    %107 = arith.addf %102, %106 : vector<8x8xf32>
    %108 = tpu.concatenate %93, %107 in 0 : vector<8x8xf32>, vector<8x8xf32> -> vector<16x8xf32>
    %cst_65 = arith.constant dense<0.000000e+00> : vector<16xf32>
    %109 = vector.multi_reduction <add>, %108, %cst_65 [1] : vector<16x8xf32> to vector<16xf32>
    %110 = vector.shape_cast %109 : vector<16xf32> to vector<16x1xf32>
    %111 = arith.mulf %108, %108 : vector<16x8xf32>
    %cst_66 = arith.constant dense<0.000000e+00> : vector<16xf32>
    %112 = vector.multi_reduction <add>, %111, %cst_66 [1] : vector<16x8xf32> to vector<16xf32>
    %113 = vector.shape_cast %112 : vector<16xf32> to vector<16x1xf32>
    %114 = vector.extract_strided_slice %110 {offsets = [0, 0], sizes = [8, 1], strides = [1, 1]} : vector<16x1xf32> to vector<8x1xf32>
    %115 = vector.extract_strided_slice %113 {offsets = [0, 0], sizes = [8, 1], strides = [1, 1]} : vector<16x1xf32> to vector<8x1xf32>
    %116 = vector.extract_strided_slice %110 {offsets = [8, 0], sizes = [8, 1], strides = [1, 1]} : vector<16x1xf32> to vector<8x1xf32>
    %117 = arith.addf %114, %116 : vector<8x1xf32>
    %118 = vector.extract_strided_slice %113 {offsets = [8, 0], sizes = [8, 1], strides = [1, 1]} : vector<16x1xf32> to vector<8x1xf32>
    %119 = arith.addf %115, %118 : vector<8x1xf32>
    %cst_67 = arith.constant 6.250000e-02 : f32
    %120 = vector.broadcast %cst_67 : f32 to vector<8x1xf32>
    %121 = arith.mulf %117, %120 : vector<8x1xf32>
    %cst_68 = arith.constant 6.250000e-02 : f32
    %122 = vector.broadcast %cst_68 : f32 to vector<8x1xf32>
    %123 = arith.mulf %119, %122 : vector<8x1xf32>
    %124 = arith.mulf %121, %121 : vector<8x1xf32>
    %125 = arith.subf %123, %124 : vector<8x1xf32>
    %cst_69 = arith.constant 0.000000e+00 : f32
    %126 = vector.broadcast %cst_69 : f32 to vector<8x1xf32>
    %127 = arith.maximumf %125, %126 : vector<8x1xf32>
    %c0_70 = arith.constant 0 : index
    %c0_71 = arith.constant 0 : index
    %128 = vector.load %arg6[%c0_70, %c0_71] : memref<8x1xf32, #tpu.memory_space<vmem>>, vector<8x1xf32>
    %cst_72 = arith.constant 9.99999974E-6 : f32
    %129 = vector.broadcast %cst_72 : f32 to vector<8x1xf32>
    %130 = arith.addf %127, %129 : vector<8x1xf32>
    %131 = math.rsqrt %130 : vector<8x1xf32>
    %132 = arith.mulf %128, %131 : vector<8x1xf32>
    %c0_73 = arith.constant 0 : index
    %c0_74 = arith.constant 0 : index
    %133 = vector.load %arg7[%c0_73, %c0_74] : memref<8x1xf32, #tpu.memory_space<vmem>>, vector<8x1xf32>
    %134 = arith.mulf %121, %132 : vector<8x1xf32>
    %135 = arith.subf %133, %134 : vector<8x1xf32>
    %136 = tpu.concatenate %132, %132 in 0 : vector<8x1xf32>, vector<8x1xf32> -> vector<16x1xf32>
    %137 = tpu.concatenate %135, %135 in 0 : vector<8x1xf32>, vector<8x1xf32> -> vector<16x1xf32>
    %138 = vector.broadcast %136 : vector<16x1xf32> to vector<16x8xf32>
    %139 = arith.mulf %108, %138 : vector<16x8xf32>
    %140 = vector.broadcast %137 : vector<16x1xf32> to vector<16x8xf32>
    %141 = arith.addf %139, %140 : vector<16x8xf32>
    %cst_75 = arith.constant 0.000000e+00 : f32
    %142 = vector.broadcast %cst_75 : f32 to vector<16x8xf32>
    %143 = arith.maximumf %141, %142 : vector<16x8xf32>
    %c0_76 = arith.constant 0 : index
    %c0_77 = arith.constant 0 : index
    %144 = vector.load %arg8[%c0_76, %c0_77] : memref<16x8xf32, #tpu.memory_space<vmem>>, vector<16x8xf32>
    tpu.vector_store %arg8[%c0_76, %c0_77], %143 {strides = array<i32>} : memref<16x8xf32, #tpu.memory_space<vmem>>, vector<16x8xf32>,
    return
  }
}

module attributes {stable_mosaic.version = 11 : i64} {
  func.func @kernel(%arg0: memref<32x32xf32, #tpu.memory_space<vmem>>, %arg1: memref<32x32xbf16, #tpu.memory_space<vmem>>, %arg2: memref<3x8x16xf32, #tpu.memory_space<vmem>>, %arg3: memref<8x1xf32, #tpu.memory_space<vmem>>, %arg4: memref<8x1xf32, #tpu.memory_space<vmem>>, %arg5: memref<3x4x8xf32, #tpu.memory_space<vmem>>, %arg6: memref<4x1xf32, #tpu.memory_space<vmem>>, %arg7: memref<4x1xf32, #tpu.memory_space<vmem>>, %arg8: memref<8x32xf32, #tpu.memory_space<vmem>>) attributes {dimension_semantics = [], scalar_prefetch = 0 : i64, scratch_operands = 0 : i64, tpu.core_type = #tpu.core_type<tc>} {
    %c0 = arith.constant 0 : index
    %c0_0 = arith.constant 0 : index
    %0 = vector.load %arg1[%c0, %c0_0] : memref<32x32xbf16, #tpu.memory_space<vmem>>, vector<32x32xbf16>
    %c0_1 = arith.constant 0 : index
    %c0_2 = arith.constant 0 : index
    %1 = vector.load %arg0[%c0_1, %c0_2] : memref<32x32xf32, #tpu.memory_space<vmem>>, vector<32x32xf32>
    %2 = arith.truncf %1 : vector<32x32xf32> to vector<32x32xbf16>
    %cst = arith.constant dense<0.000000e+00> : vector<32x32xf32>
    %3 = tpu.matmul %2, %0, %cst {dimension_numbers = #tpu.dot_dimension_numbers<[1], [0], [0], [1], [0, 0, 1, 1], [], []>} : vector<32x32xbf16>, vector<32x32xbf16>, vector<32x32xf32> -> vector<32x32xf32>
    %4 = arith.truncf %3 : vector<32x32xf32> to vector<32x32xbf16>
    %cst_3 = arith.constant dense<0.000000e+00> : vector<32x32xf32>
    %5 = tpu.matmul %4, %0, %cst_3 {dimension_numbers = #tpu.dot_dimension_numbers<[1], [0], [0], [1], [0, 0, 1, 1], [], []>} : vector<32x32xbf16>, vector<32x32xbf16>, vector<32x32xf32> -> vector<32x32xf32>
    %cst_4 = arith.constant 2.000000e+00 : f32
    %6 = vector.broadcast %cst_4 : f32 to vector<32x32xf32>
    %7 = arith.mulf %6, %5 : vector<32x32xf32>
    %8 = arith.subf %7, %1 : vector<32x32xf32>
    %c0_5 = arith.constant 0 : index
    %c0_6 = arith.constant 0 : index
    %c0_7 = arith.constant 0 : index
    %9 = vector.load %arg2[%c0_5, %c0_6, %c0_7] : memref<3x8x16xf32, #tpu.memory_space<vmem>>, vector<1x8x16xf32>
    %10 = vector.shape_cast %9 : vector<1x8x16xf32> to vector<8x16xf32>
    %11 = vector.extract_strided_slice %1 {offsets = [0, 0], sizes = [16, 32], strides = [1, 1]} : vector<32x32xf32> to vector<16x32xf32>
    %cst_8 = arith.constant dense<0.000000e+00> : vector<8x32xf32>
    %12 = tpu.matmul %10, %11, %cst_8 {dimension_numbers = #tpu.dot_dimension_numbers<[1], [0], [0], [1], [0, 0, 1, 1], [], []>} : vector<8x16xf32>, vector<16x32xf32>, vector<8x32xf32> -> vector<8x32xf32>
    %c1 = arith.constant 1 : index
    %c0_9 = arith.constant 0 : index
    %c0_10 = arith.constant 0 : index
    %13 = vector.load %arg2[%c1, %c0_9, %c0_10] : memref<3x8x16xf32, #tpu.memory_space<vmem>>, vector<1x8x16xf32>
    %14 = vector.shape_cast %13 : vector<1x8x16xf32> to vector<8x16xf32>
    %15 = vector.extract_strided_slice %3 {offsets = [0, 0], sizes = [16, 32], strides = [1, 1]} : vector<32x32xf32> to vector<16x32xf32>
    %cst_11 = arith.constant dense<0.000000e+00> : vector<8x32xf32>
    %16 = tpu.matmul %14, %15, %cst_11 {dimension_numbers = #tpu.dot_dimension_numbers<[1], [0], [0], [1], [0, 0, 1, 1], [], []>} : vector<8x16xf32>, vector<16x32xf32>, vector<8x32xf32> -> vector<8x32xf32>
    %17 = arith.addf %12, %16 : vector<8x32xf32>
    %c2 = arith.constant 2 : index
    %c0_12 = arith.constant 0 : index
    %c0_13 = arith.constant 0 : index
    %18 = vector.load %arg2[%c2, %c0_12, %c0_13] : memref<3x8x16xf32, #tpu.memory_space<vmem>>, vector<1x8x16xf32>
    %19 = vector.shape_cast %18 : vector<1x8x16xf32> to vector<8x16xf32>
    %20 = vector.extract_strided_slice %8 {offsets = [0, 0], sizes = [16, 32], strides = [1, 1]} : vector<32x32xf32> to vector<16x32xf32>
    %cst_14 = arith.constant dense<0.000000e+00> : vector<8x32xf32>
    %21 = tpu.matmul %19, %20, %cst_14 {dimension_numbers = #tpu.dot_dimension_numbers<[1], [0], [0], [1], [0, 0, 1, 1], [], []>} : vector<8x16xf32>, vector<16x32xf32>, vector<8x32xf32> -> vector<8x32xf32>
    %22 = arith.addf %17, %21 : vector<8x32xf32>
    %c0_15 = arith.constant 0 : index
    %c0_16 = arith.constant 0 : index
    %c0_17 = arith.constant 0 : index
    %23 = vector.load %arg2[%c0_15, %c0_16, %c0_17] : memref<3x8x16xf32, #tpu.memory_space<vmem>>, vector<1x8x16xf32>
    %24 = vector.shape_cast %23 : vector<1x8x16xf32> to vector<8x16xf32>
    %25 = vector.extract_strided_slice %1 {offsets = [16, 0], sizes = [16, 32], strides = [1, 1]} : vector<32x32xf32> to vector<16x32xf32>
    %cst_18 = arith.constant dense<0.000000e+00> : vector<8x32xf32>
    %26 = tpu.matmul %24, %25, %cst_18 {dimension_numbers = #tpu.dot_dimension_numbers<[1], [0], [0], [1], [0, 0, 1, 1], [], []>} : vector<8x16xf32>, vector<16x32xf32>, vector<8x32xf32> -> vector<8x32xf32>
    %c1_19 = arith.constant 1 : index
    %c0_20 = arith.constant 0 : index
    %c0_21 = arith.constant 0 : index
    %27 = vector.load %arg2[%c1_19, %c0_20, %c0_21] : memref<3x8x16xf32, #tpu.memory_space<vmem>>, vector<1x8x16xf32>
    %28 = vector.shape_cast %27 : vector<1x8x16xf32> to vector<8x16xf32>
    %29 = vector.extract_strided_slice %3 {offsets = [16, 0], sizes = [16, 32], strides = [1, 1]} : vector<32x32xf32> to vector<16x32xf32>
    %cst_22 = arith.constant dense<0.000000e+00> : vector<8x32xf32>
    %30 = tpu.matmul %28, %29, %cst_22 {dimension_numbers = #tpu.dot_dimension_numbers<[1], [0], [0], [1], [0, 0, 1, 1], [], []>} : vector<8x16xf32>, vector<16x32xf32>, vector<8x32xf32> -> vector<8x32xf32>
    %31 = arith.addf %26, %30 : vector<8x32xf32>
    %c2_23 = arith.constant 2 : index
    %c0_24 = arith.constant 0 : index
    %c0_25 = arith.constant 0 : index
    %32 = vector.load %arg2[%c2_23, %c0_24, %c0_25] : memref<3x8x16xf32, #tpu.memory_space<vmem>>, vector<1x8x16xf32>
    %33 = vector.shape_cast %32 : vector<1x8x16xf32> to vector<8x16xf32>
    %34 = vector.extract_strided_slice %8 {offsets = [16, 0], sizes = [16, 32], strides = [1, 1]} : vector<32x32xf32> to vector<16x32xf32>
    %cst_26 = arith.constant dense<0.000000e+00> : vector<8x32xf32>
    %35 = tpu.matmul %33, %34, %cst_26 {dimension_numbers = #tpu.dot_dimension_numbers<[1], [0], [0], [1], [0, 0, 1, 1], [], []>} : vector<8x16xf32>, vector<16x32xf32>, vector<8x32xf32> -> vector<8x32xf32>
    %36 = arith.addf %31, %35 : vector<8x32xf32>
    %37 = tpu.concatenate %22, %36 in 0 : vector<8x32xf32>, vector<8x32xf32> -> vector<16x32xf32>
    %cst_27 = arith.constant dense<0.000000e+00> : vector<16xf32>
    %38 = vector.multi_reduction <add>, %37, %cst_27 [1] : vector<16x32xf32> to vector<16xf32>
    %39 = vector.shape_cast %38 : vector<16xf32> to vector<16x1xf32>
    %40 = arith.mulf %37, %37 : vector<16x32xf32>
    %cst_28 = arith.constant dense<0.000000e+00> : vector<16xf32>
    %41 = vector.multi_reduction <add>, %40, %cst_28 [1] : vector<16x32xf32> to vector<16xf32>
    %42 = vector.shape_cast %41 : vector<16xf32> to vector<16x1xf32>
    %43 = vector.extract_strided_slice %39 {offsets = [0, 0], sizes = [8, 1], strides = [1, 1]} : vector<16x1xf32> to vector<8x1xf32>
    %44 = vector.extract_strided_slice %42 {offsets = [0, 0], sizes = [8, 1], strides = [1, 1]} : vector<16x1xf32> to vector<8x1xf32>
    %45 = vector.extract_strided_slice %39 {offsets = [8, 0], sizes = [8, 1], strides = [1, 1]} : vector<16x1xf32> to vector<8x1xf32>
    %46 = arith.addf %43, %45 : vector<8x1xf32>
    %47 = vector.extract_strided_slice %42 {offsets = [8, 0], sizes = [8, 1], strides = [1, 1]} : vector<16x1xf32> to vector<8x1xf32>
    %48 = arith.addf %44, %47 : vector<8x1xf32>
    %cst_29 = arith.constant 1.562500e-02 : f32
    %49 = vector.broadcast %cst_29 : f32 to vector<8x1xf32>
    %50 = arith.mulf %46, %49 : vector<8x1xf32>
    %cst_30 = arith.constant 1.562500e-02 : f32
    %51 = vector.broadcast %cst_30 : f32 to vector<8x1xf32>
    %52 = arith.mulf %48, %51 : vector<8x1xf32>
    %53 = arith.mulf %50, %50 : vector<8x1xf32>
    %54 = arith.subf %52, %53 : vector<8x1xf32>
    %cst_31 = arith.constant 0.000000e+00 : f32
    %55 = vector.broadcast %cst_31 : f32 to vector<8x1xf32>
    %56 = arith.maximumf %54, %55 : vector<8x1xf32>
    %c0_32 = arith.constant 0 : index
    %c0_33 = arith.constant 0 : index
    %57 = vector.load %arg3[%c0_32, %c0_33] : memref<8x1xf32, #tpu.memory_space<vmem>>, vector<8x1xf32>
    %cst_34 = arith.constant 9.99999974E-6 : f32
    %58 = vector.broadcast %cst_34 : f32 to vector<8x1xf32>
    %59 = arith.addf %56, %58 : vector<8x1xf32>
    %60 = math.rsqrt %59 : vector<8x1xf32>
    %61 = arith.mulf %57, %60 : vector<8x1xf32>
    %c0_35 = arith.constant 0 : index
    %c0_36 = arith.constant 0 : index
    %62 = vector.load %arg4[%c0_35, %c0_36] : memref<8x1xf32, #tpu.memory_space<vmem>>, vector<8x1xf32>
    %63 = arith.mulf %50, %61 : vector<8x1xf32>
    %64 = arith.subf %62, %63 : vector<8x1xf32>
    %65 = tpu.concatenate %61, %61 in 0 : vector<8x1xf32>, vector<8x1xf32> -> vector<16x1xf32>
    %66 = tpu.concatenate %64, %64 in 0 : vector<8x1xf32>, vector<8x1xf32> -> vector<16x1xf32>
    %67 = vector.broadcast %65 : vector<16x1xf32> to vector<16x32xf32>
    %68 = arith.mulf %37, %67 : vector<16x32xf32>
    %69 = vector.broadcast %66 : vector<16x1xf32> to vector<16x32xf32>
    %70 = arith.addf %68, %69 : vector<16x32xf32>
    %cst_37 = arith.constant 0.000000e+00 : f32
    %71 = vector.broadcast %cst_37 : f32 to vector<16x32xf32>
    %72 = arith.maximumf %70, %71 : vector<16x32xf32>
    %73 = arith.truncf %72 : vector<16x32xf32> to vector<16x32xbf16>
    %cst_38 = arith.constant dense<0.000000e+00> : vector<16x32xf32>
    %74 = tpu.matmul %73, %0, %cst_38 {dimension_numbers = #tpu.dot_dimension_numbers<[1], [0], [0], [1], [0, 0, 1, 1], [], []>} : vector<16x32xbf16>, vector<32x32xbf16>, vector<16x32xf32> -> vector<16x32xf32>
    %75 = arith.truncf %74 : vector<16x32xf32> to vector<16x32xbf16>
    %cst_39 = arith.constant dense<0.000000e+00> : vector<16x32xf32>
    %76 = tpu.matmul %75, %0, %cst_39 {dimension_numbers = #tpu.dot_dimension_numbers<[1], [0], [0], [1], [0, 0, 1, 1], [], []>} : vector<16x32xbf16>, vector<32x32xbf16>, vector<16x32xf32> -> vector<16x32xf32>
    %cst_40 = arith.constant 2.000000e+00 : f32
    %77 = vector.broadcast %cst_40 : f32 to vector<16x32xf32>
    %78 = arith.mulf %77, %76 : vector<16x32xf32>
    %79 = arith.subf %78, %72 : vector<16x32xf32>
    %c0_41 = arith.constant 0 : index
    %c0_42 = arith.constant 0 : index
    %c0_43 = arith.constant 0 : index
    %80 = vector.load %arg5[%c0_41, %c0_42, %c0_43] : memref<3x4x8xf32, #tpu.memory_space<vmem>>, vector<1x4x8xf32>
    %81 = vector.shape_cast %80 : vector<1x4x8xf32> to vector<4x8xf32>
    %82 = vector.extract_strided_slice %72 {offsets = [0, 0], sizes = [8, 32], strides = [1, 1]} : vector<16x32xf32> to vector<8x32xf32>
    %cst_44 = arith.constant dense<0.000000e+00> : vector<4x32xf32>
    %83 = tpu.matmul %81, %82, %cst_44 {dimension_numbers = #tpu.dot_dimension_numbers<[1], [0], [0], [1], [0, 0, 1, 1], [], []>} : vector<4x8xf32>, vector<8x32xf32>, vector<4x32xf32> -> vector<4x32xf32>
    %c1_45 = arith.constant 1 : index
    %c0_46 = arith.constant 0 : index
    %c0_47 = arith.constant 0 : index
    %84 = vector.load %arg5[%c1_45, %c0_46, %c0_47] : memref<3x4x8xf32, #tpu.memory_space<vmem>>, vector<1x4x8xf32>
    %85 = vector.shape_cast %84 : vector<1x4x8xf32> to vector<4x8xf32>
    %86 = vector.extract_strided_slice %74 {offsets = [0, 0], sizes = [8, 32], strides = [1, 1]} : vector<16x32xf32> to vector<8x32xf32>
    %cst_48 = arith.constant dense<0.000000e+00> : vector<4x32xf32>
    %87 = tpu.matmul %85, %86, %cst_48 {dimension_numbers = #tpu.dot_dimension_numbers<[1], [0], [0], [1], [0, 0, 1, 1], [], []>} : vector<4x8xf32>, vector<8x32xf32>, vector<4x32xf32> -> vector<4x32xf32>
    %88 = arith.addf %83, %87 : vector<4x32xf32>
    %c2_49 = arith.constant 2 : index
    %c0_50 = arith.constant 0 : index
    %c0_51 = arith.constant 0 : index
    %89 = vector.load %arg5[%c2_49, %c0_50, %c0_51] : memref<3x4x8xf32, #tpu.memory_space<vmem>>, vector<1x4x8xf32>
    %90 = vector.shape_cast %89 : vector<1x4x8xf32> to vector<4x8xf32>
    %91 = vector.extract_strided_slice %79 {offsets = [0, 0], sizes = [8, 32], strides = [1, 1]} : vector<16x32xf32> to vector<8x32xf32>
    %cst_52 = arith.constant dense<0.000000e+00> : vector<4x32xf32>
    %92 = tpu.matmul %90, %91, %cst_52 {dimension_numbers = #tpu.dot_dimension_numbers<[1], [0], [0], [1], [0, 0, 1, 1], [], []>} : vector<4x8xf32>, vector<8x32xf32>, vector<4x32xf32> -> vector<4x32xf32>
    %93 = arith.addf %88, %92 : vector<4x32xf32>
    %c0_53 = arith.constant 0 : index
    %c0_54 = arith.constant 0 : index
    %c0_55 = arith.constant 0 : index
    %94 = vector.load %arg5[%c0_53, %c0_54, %c0_55] : memref<3x4x8xf32, #tpu.memory_space<vmem>>, vector<1x4x8xf32>
    %95 = vector.shape_cast %94 : vector<1x4x8xf32> to vector<4x8xf32>
    %96 = vector.extract_strided_slice %72 {offsets = [8, 0], sizes = [8, 32], strides = [1, 1]} : vector<16x32xf32> to vector<8x32xf32>
    %cst_56 = arith.constant dense<0.000000e+00> : vector<4x32xf32>
    %97 = tpu.matmul %95, %96, %cst_56 {dimension_numbers = #tpu.dot_dimension_numbers<[1], [0], [0], [1], [0, 0, 1, 1], [], []>} : vector<4x8xf32>, vector<8x32xf32>, vector<4x32xf32> -> vector<4x32xf32>
    %c1_57 = arith.constant 1 : index
    %c0_58 = arith.constant 0 : index
    %c0_59 = arith.constant 0 : index
    %98 = vector.load %arg5[%c1_57, %c0_58, %c0_59] : memref<3x4x8xf32, #tpu.memory_space<vmem>>, vector<1x4x8xf32>
    %99 = vector.shape_cast %98 : vector<1x4x8xf32> to vector<4x8xf32>
    %100 = vector.extract_strided_slice %74 {offsets = [8, 0], sizes = [8, 32], strides = [1, 1]} : vector<16x32xf32> to vector<8x32xf32>
    %cst_60 = arith.constant dense<0.000000e+00> : vector<4x32xf32>
    %101 = tpu.matmul %99, %100, %cst_60 {dimension_numbers = #tpu.dot_dimension_numbers<[1], [0], [0], [1], [0, 0, 1, 1], [], []>} : vector<4x8xf32>, vector<8x32xf32>, vector<4x32xf32> -> vector<4x32xf32>
    %102 = arith.addf %97, %101 : vector<4x32xf32>
    %c2_61 = arith.constant 2 : index
    %c0_62 = arith.constant 0 : index
    %c0_63 = arith.constant 0 : index
    %103 = vector.load %arg5[%c2_61, %c0_62, %c0_63] : memref<3x4x8xf32, #tpu.memory_space<vmem>>, vector<1x4x8xf32>
    %104 = vector.shape_cast %103 : vector<1x4x8xf32> to vector<4x8xf32>
    %105 = vector.extract_strided_slice %79 {offsets = [8, 0], sizes = [8, 32], strides = [1, 1]} : vector<16x32xf32> to vector<8x32xf32>
    %cst_64 = arith.constant dense<0.000000e+00> : vector<4x32xf32>
    %106 = tpu.matmul %104, %105, %cst_64 {dimension_numbers = #tpu.dot_dimension_numbers<[1], [0], [0], [1], [0, 0, 1, 1], [], []>} : vector<4x8xf32>, vector<8x32xf32>, vector<4x32xf32> -> vector<4x32xf32>
    %107 = arith.addf %102, %106 : vector<4x32xf32>
    %108 = tpu.concatenate %93, %107 in 0 : vector<4x32xf32>, vector<4x32xf32> -> vector<8x32xf32>
    %cst_65 = arith.constant dense<0.000000e+00> : vector<8xf32>
    %109 = vector.multi_reduction <add>, %108, %cst_65 [1] : vector<8x32xf32> to vector<8xf32>
    %110 = vector.shape_cast %109 : vector<8xf32> to vector<8x1xf32>
    %111 = arith.mulf %108, %108 : vector<8x32xf32>
    %cst_66 = arith.constant dense<0.000000e+00> : vector<8xf32>
    %112 = vector.multi_reduction <add>, %111, %cst_66 [1] : vector<8x32xf32> to vector<8xf32>
    %113 = vector.shape_cast %112 : vector<8xf32> to vector<8x1xf32>
    %114 = vector.extract_strided_slice %110 {offsets = [0, 0], sizes = [4, 1], strides = [1, 1]} : vector<8x1xf32> to vector<4x1xf32>
    %115 = vector.extract_strided_slice %113 {offsets = [0, 0], sizes = [4, 1], strides = [1, 1]} : vector<8x1xf32> to vector<4x1xf32>
    %116 = vector.extract_strided_slice %110 {offsets = [4, 0], sizes = [4, 1], strides = [1, 1]} : vector<8x1xf32> to vector<4x1xf32>
    %117 = arith.addf %114, %116 : vector<4x1xf32>
    %118 = vector.extract_strided_slice %113 {offsets = [4, 0], sizes = [4, 1], strides = [1, 1]} : vector<8x1xf32> to vector<4x1xf32>
    %119 = arith.addf %115, %118 : vector<4x1xf32>
    %cst_67 = arith.constant 1.562500e-02 : f32
    %120 = vector.broadcast %cst_67 : f32 to vector<4x1xf32>
    %121 = arith.mulf %117, %120 : vector<4x1xf32>
    %cst_68 = arith.constant 1.562500e-02 : f32
    %122 = vector.broadcast %cst_68 : f32 to vector<4x1xf32>
    %123 = arith.mulf %119, %122 : vector<4x1xf32>
    %124 = arith.mulf %121, %121 : vector<4x1xf32>
    %125 = arith.subf %123, %124 : vector<4x1xf32>
    %cst_69 = arith.constant 0.000000e+00 : f32
    %126 = vector.broadcast %cst_69 : f32 to vector<4x1xf32>
    %127 = arith.maximumf %125, %126 : vector<4x1xf32>
    %c0_70 = arith.constant 0 : index
    %c0_71 = arith.constant 0 : index
    %128 = vector.load %arg6[%c0_70, %c0_71] : memref<4x1xf32, #tpu.memory_space<vmem>>, vector<4x1xf32>
    %cst_72 = arith.constant 9.99999974E-6 : f32
    %129 = vector.broadcast %cst_72 : f32 to vector<4x1xf32>
    %130 = arith.addf %127, %129 : vector<4x1xf32>
    %131 = math.rsqrt %130 : vector<4x1xf32>
    %132 = arith.mulf %128, %131 : vector<4x1xf32>
    %c0_73 = arith.constant 0 : index
    %c0_74 = arith.constant 0 : index
    %133 = vector.load %arg7[%c0_73, %c0_74] : memref<4x1xf32, #tpu.memory_space<vmem>>, vector<4x1xf32>
    %134 = arith.mulf %121, %132 : vector<4x1xf32>
    %135 = arith.subf %133, %134 : vector<4x1xf32>
    %136 = tpu.concatenate %132, %132 in 0 : vector<4x1xf32>, vector<4x1xf32> -> vector<8x1xf32>
    %137 = tpu.concatenate %135, %135 in 0 : vector<4x1xf32>, vector<4x1xf32> -> vector<8x1xf32>
    %138 = vector.broadcast %136 : vector<8x1xf32> to vector<8x32xf32>
    %139 = arith.mulf %108, %138 : vector<8x32xf32>
    %140 = vector.broadcast %137 : vector<8x1xf32> to vector<8x32xf32>
    %141 = arith.addf %139, %140 : vector<8x32xf32>
    %cst_75 = arith.constant 0.000000e+00 : f32
    %142 = vector.broadcast %cst_75 : f32 to vector<8x32xf32>
    %143 = arith.maximumf %141, %142 : vector<8x32xf32>
    %c0_76 = arith.constant 0 : index
    %c0_77 = arith.constant 0 : index
    %144 = vector.load %arg8[%c0_76, %c0_77] : memref<8x32xf32, #tpu.memory_space<vmem>>, vector<8x32xf32>
    tpu.vector_store %arg8[%c0_76, %c0_77], %143 {strides = array<i32>} : memref<8x32xf32, #tpu.memory_space<vmem>>, vector<8x32xf32>,
    return
  }
}

module attributes {stable_mosaic.version = 11 : i64} {
  func.func @kernel(%arg0: memref<16x128xf32, #tpu.memory_space<vmem>>, %arg1: memref<128x128xbf16, #tpu.memory_space<vmem>>, %arg2: memref<3x4x8xf32, #tpu.memory_space<vmem>>, %arg3: memref<4x1xf32, #tpu.memory_space<vmem>>, %arg4: memref<4x1xf32, #tpu.memory_space<vmem>>, %arg5: memref<3x4x4xf32, #tpu.memory_space<vmem>>, %arg6: memref<4x1xf32, #tpu.memory_space<vmem>>, %arg7: memref<4x1xf32, #tpu.memory_space<vmem>>, %arg8: memref<3x3x4xf32, #tpu.memory_space<vmem>>, %arg9: memref<3x1xf32, #tpu.memory_space<vmem>>, %arg10: memref<6x128xf32, #tpu.memory_space<vmem>>) attributes {dimension_semantics = [], scalar_prefetch = 0 : i64, scratch_operands = 0 : i64, tpu.core_type = #tpu.core_type<tc>} {
    %c0 = arith.constant 0 : index
    %c0_0 = arith.constant 0 : index
    %0 = vector.load %arg1[%c0, %c0_0] : memref<128x128xbf16, #tpu.memory_space<vmem>>, vector<128x128xbf16>
    %c0_1 = arith.constant 0 : index
    %c0_2 = arith.constant 0 : index
    %1 = vector.load %arg0[%c0_1, %c0_2] : memref<16x128xf32, #tpu.memory_space<vmem>>, vector<16x128xf32>
    %2 = arith.truncf %1 : vector<16x128xf32> to vector<16x128xbf16>
    %cst = arith.constant dense<0.000000e+00> : vector<16x128xf32>
    %3 = tpu.matmul %2, %0, %cst {dimension_numbers = #tpu.dot_dimension_numbers<[1], [0], [0], [1], [0, 0, 1, 1], [], []>} : vector<16x128xbf16>, vector<128x128xbf16>, vector<16x128xf32> -> vector<16x128xf32>
    %4 = arith.truncf %3 : vector<16x128xf32> to vector<16x128xbf16>
    %cst_3 = arith.constant dense<0.000000e+00> : vector<16x128xf32>
    %5 = tpu.matmul %4, %0, %cst_3 {dimension_numbers = #tpu.dot_dimension_numbers<[1], [0], [0], [1], [0, 0, 1, 1], [], []>} : vector<16x128xbf16>, vector<128x128xbf16>, vector<16x128xf32> -> vector<16x128xf32>
    %cst_4 = arith.constant 2.000000e+00 : f32
    %6 = vector.broadcast %cst_4 : f32 to vector<16x128xf32>
    %7 = arith.mulf %6, %5 : vector<16x128xf32>
    %8 = arith.subf %7, %1 : vector<16x128xf32>
    %c0_5 = arith.constant 0 : index
    %c0_6 = arith.constant 0 : index
    %c0_7 = arith.constant 0 : index
    %9 = vector.load %arg2[%c0_5, %c0_6, %c0_7] : memref<3x4x8xf32, #tpu.memory_space<vmem>>, vector<1x4x8xf32>
    %10 = vector.shape_cast %9 : vector<1x4x8xf32> to vector<4x8xf32>
    %11 = vector.extract_strided_slice %1 {offsets = [0, 0], sizes = [8, 128], strides = [1, 1]} : vector<16x128xf32> to vector<8x128xf32>
    %cst_8 = arith.constant dense<0.000000e+00> : vector<4x128xf32>
    %12 = tpu.matmul %10, %11, %cst_8 {dimension_numbers = #tpu.dot_dimension_numbers<[1], [0], [0], [1], [0, 0, 1, 1], [], []>} : vector<4x8xf32>, vector<8x128xf32>, vector<4x128xf32> -> vector<4x128xf32>
    %c1 = arith.constant 1 : index
    %c0_9 = arith.constant 0 : index
    %c0_10 = arith.constant 0 : index
    %13 = vector.load %arg2[%c1, %c0_9, %c0_10] : memref<3x4x8xf32, #tpu.memory_space<vmem>>, vector<1x4x8xf32>
    %14 = vector.shape_cast %13 : vector<1x4x8xf32> to vector<4x8xf32>
    %15 = vector.extract_strided_slice %3 {offsets = [0, 0], sizes = [8, 128], strides = [1, 1]} : vector<16x128xf32> to vector<8x128xf32>
    %cst_11 = arith.constant dense<0.000000e+00> : vector<4x128xf32>
    %16 = tpu.matmul %14, %15, %cst_11 {dimension_numbers = #tpu.dot_dimension_numbers<[1], [0], [0], [1], [0, 0, 1, 1], [], []>} : vector<4x8xf32>, vector<8x128xf32>, vector<4x128xf32> -> vector<4x128xf32>
    %17 = arith.addf %12, %16 : vector<4x128xf32>
    %c2 = arith.constant 2 : index
    %c0_12 = arith.constant 0 : index
    %c0_13 = arith.constant 0 : index
    %18 = vector.load %arg2[%c2, %c0_12, %c0_13] : memref<3x4x8xf32, #tpu.memory_space<vmem>>, vector<1x4x8xf32>
    %19 = vector.shape_cast %18 : vector<1x4x8xf32> to vector<4x8xf32>
    %20 = vector.extract_strided_slice %8 {offsets = [0, 0], sizes = [8, 128], strides = [1, 1]} : vector<16x128xf32> to vector<8x128xf32>
    %cst_14 = arith.constant dense<0.000000e+00> : vector<4x128xf32>
    %21 = tpu.matmul %19, %20, %cst_14 {dimension_numbers = #tpu.dot_dimension_numbers<[1], [0], [0], [1], [0, 0, 1, 1], [], []>} : vector<4x8xf32>, vector<8x128xf32>, vector<4x128xf32> -> vector<4x128xf32>
    %22 = arith.addf %17, %21 : vector<4x128xf32>
    %c0_15 = arith.constant 0 : index
    %c0_16 = arith.constant 0 : index
    %c0_17 = arith.constant 0 : index
    %23 = vector.load %arg2[%c0_15, %c0_16, %c0_17] : memref<3x4x8xf32, #tpu.memory_space<vmem>>, vector<1x4x8xf32>
    %24 = vector.shape_cast %23 : vector<1x4x8xf32> to vector<4x8xf32>
    %25 = vector.extract_strided_slice %1 {offsets = [8, 0], sizes = [8, 128], strides = [1, 1]} : vector<16x128xf32> to vector<8x128xf32>
    %cst_18 = arith.constant dense<0.000000e+00> : vector<4x128xf32>
    %26 = tpu.matmul %24, %25, %cst_18 {dimension_numbers = #tpu.dot_dimension_numbers<[1], [0], [0], [1], [0, 0, 1, 1], [], []>} : vector<4x8xf32>, vector<8x128xf32>, vector<4x128xf32> -> vector<4x128xf32>
    %c1_19 = arith.constant 1 : index
    %c0_20 = arith.constant 0 : index
    %c0_21 = arith.constant 0 : index
    %27 = vector.load %arg2[%c1_19, %c0_20, %c0_21] : memref<3x4x8xf32, #tpu.memory_space<vmem>>, vector<1x4x8xf32>
    %28 = vector.shape_cast %27 : vector<1x4x8xf32> to vector<4x8xf32>
    %29 = vector.extract_strided_slice %3 {offsets = [8, 0], sizes = [8, 128], strides = [1, 1]} : vector<16x128xf32> to vector<8x128xf32>
    %cst_22 = arith.constant dense<0.000000e+00> : vector<4x128xf32>
    %30 = tpu.matmul %28, %29, %cst_22 {dimension_numbers = #tpu.dot_dimension_numbers<[1], [0], [0], [1], [0, 0, 1, 1], [], []>} : vector<4x8xf32>, vector<8x128xf32>, vector<4x128xf32> -> vector<4x128xf32>
    %31 = arith.addf %26, %30 : vector<4x128xf32>
    %c2_23 = arith.constant 2 : index
    %c0_24 = arith.constant 0 : index
    %c0_25 = arith.constant 0 : index
    %32 = vector.load %arg2[%c2_23, %c0_24, %c0_25] : memref<3x4x8xf32, #tpu.memory_space<vmem>>, vector<1x4x8xf32>
    %33 = vector.shape_cast %32 : vector<1x4x8xf32> to vector<4x8xf32>
    %34 = vector.extract_strided_slice %8 {offsets = [8, 0], sizes = [8, 128], strides = [1, 1]} : vector<16x128xf32> to vector<8x128xf32>
    %cst_26 = arith.constant dense<0.000000e+00> : vector<4x128xf32>
    %35 = tpu.matmul %33, %34, %cst_26 {dimension_numbers = #tpu.dot_dimension_numbers<[1], [0], [0], [1], [0, 0, 1, 1], [], []>} : vector<4x8xf32>, vector<8x128xf32>, vector<4x128xf32> -> vector<4x128xf32>
    %36 = arith.addf %31, %35 : vector<4x128xf32>
    %37 = tpu.concatenate %22, %36 in 0 : vector<4x128xf32>, vector<4x128xf32> -> vector<8x128xf32>
    %cst_27 = arith.constant dense<0.000000e+00> : vector<8xf32>
    %38 = vector.multi_reduction <add>, %37, %cst_27 [1] : vector<8x128xf32> to vector<8xf32>
    %39 = vector.shape_cast %38 : vector<8xf32> to vector<8x1xf32>
    %40 = arith.mulf %37, %37 : vector<8x128xf32>
    %cst_28 = arith.constant dense<0.000000e+00> : vector<8xf32>
    %41 = vector.multi_reduction <add>, %40, %cst_28 [1] : vector<8x128xf32> to vector<8xf32>
    %42 = vector.shape_cast %41 : vector<8xf32> to vector<8x1xf32>
    %43 = vector.extract_strided_slice %39 {offsets = [0, 0], sizes = [4, 1], strides = [1, 1]} : vector<8x1xf32> to vector<4x1xf32>
    %44 = vector.extract_strided_slice %42 {offsets = [0, 0], sizes = [4, 1], strides = [1, 1]} : vector<8x1xf32> to vector<4x1xf32>
    %45 = vector.extract_strided_slice %39 {offsets = [4, 0], sizes = [4, 1], strides = [1, 1]} : vector<8x1xf32> to vector<4x1xf32>
    %46 = arith.addf %43, %45 : vector<4x1xf32>
    %47 = vector.extract_strided_slice %42 {offsets = [4, 0], sizes = [4, 1], strides = [1, 1]} : vector<8x1xf32> to vector<4x1xf32>
    %48 = arith.addf %44, %47 : vector<4x1xf32>
    %cst_29 = arith.constant 3.906250e-03 : f32
    %49 = vector.broadcast %cst_29 : f32 to vector<4x1xf32>
    %50 = arith.mulf %46, %49 : vector<4x1xf32>
    %cst_30 = arith.constant 3.906250e-03 : f32
    %51 = vector.broadcast %cst_30 : f32 to vector<4x1xf32>
    %52 = arith.mulf %48, %51 : vector<4x1xf32>
    %53 = arith.mulf %50, %50 : vector<4x1xf32>
    %54 = arith.subf %52, %53 : vector<4x1xf32>
    %cst_31 = arith.constant 0.000000e+00 : f32
    %55 = vector.broadcast %cst_31 : f32 to vector<4x1xf32>
    %56 = arith.maximumf %54, %55 : vector<4x1xf32>
    %c0_32 = arith.constant 0 : index
    %c0_33 = arith.constant 0 : index
    %57 = vector.load %arg3[%c0_32, %c0_33] : memref<4x1xf32, #tpu.memory_space<vmem>>, vector<4x1xf32>
    %cst_34 = arith.constant 9.99999974E-6 : f32
    %58 = vector.broadcast %cst_34 : f32 to vector<4x1xf32>
    %59 = arith.addf %56, %58 : vector<4x1xf32>
    %60 = math.rsqrt %59 : vector<4x1xf32>
    %61 = arith.mulf %57, %60 : vector<4x1xf32>
    %c0_35 = arith.constant 0 : index
    %c0_36 = arith.constant 0 : index
    %62 = vector.load %arg4[%c0_35, %c0_36] : memref<4x1xf32, #tpu.memory_space<vmem>>, vector<4x1xf32>
    %63 = arith.mulf %50, %61 : vector<4x1xf32>
    %64 = arith.subf %62, %63 : vector<4x1xf32>
    %65 = tpu.concatenate %61, %61 in 0 : vector<4x1xf32>, vector<4x1xf32> -> vector<8x1xf32>
    %66 = tpu.concatenate %64, %64 in 0 : vector<4x1xf32>, vector<4x1xf32> -> vector<8x1xf32>
    %67 = vector.broadcast %65 : vector<8x1xf32> to vector<8x128xf32>
    %68 = arith.mulf %37, %67 : vector<8x128xf32>
    %69 = vector.broadcast %66 : vector<8x1xf32> to vector<8x128xf32>
    %70 = arith.addf %68, %69 : vector<8x128xf32>
    %cst_37 = arith.constant 0.000000e+00 : f32
    %71 = vector.broadcast %cst_37 : f32 to vector<8x128xf32>
    %72 = arith.maximumf %70, %71 : vector<8x128xf32>
    %73 = arith.truncf %72 : vector<8x128xf32> to vector<8x128xbf16>
    %cst_38 = arith.constant dense<0.000000e+00> : vector<8x128xf32>
    %74 = tpu.matmul %73, %0, %cst_38 {dimension_numbers = #tpu.dot_dimension_numbers<[1], [0], [0], [1], [0, 0, 1, 1], [], []>} : vector<8x128xbf16>, vector<128x128xbf16>, vector<8x128xf32> -> vector<8x128xf32>
    %75 = arith.truncf %74 : vector<8x128xf32> to vector<8x128xbf16>
    %cst_39 = arith.constant dense<0.000000e+00> : vector<8x128xf32>
    %76 = tpu.matmul %75, %0, %cst_39 {dimension_numbers = #tpu.dot_dimension_numbers<[1], [0], [0], [1], [0, 0, 1, 1], [], []>} : vector<8x128xbf16>, vector<128x128xbf16>, vector<8x128xf32> -> vector<8x128xf32>
    %cst_40 = arith.constant 2.000000e+00 : f32
    %77 = vector.broadcast %cst_40 : f32 to vector<8x128xf32>
    %78 = arith.mulf %77, %76 : vector<8x128xf32>
    %79 = arith.subf %78, %72 : vector<8x128xf32>
    %c0_41 = arith.constant 0 : index
    %c0_42 = arith.constant 0 : index
    %c0_43 = arith.constant 0 : index
    %80 = vector.load %arg5[%c0_41, %c0_42, %c0_43] : memref<3x4x4xf32, #tpu.memory_space<vmem>>, vector<1x4x4xf32>
    %81 = vector.shape_cast %80 : vector<1x4x4xf32> to vector<4x4xf32>
    %82 = vector.extract_strided_slice %72 {offsets = [0, 0], sizes = [4, 128], strides = [1, 1]} : vector<8x128xf32> to vector<4x128xf32>
    %cst_44 = arith.constant dense<0.000000e+00> : vector<4x128xf32>
    %83 = tpu.matmul %81, %82, %cst_44 {dimension_numbers = #tpu.dot_dimension_numbers<[1], [0], [0], [1], [0, 0, 1, 1], [], []>} : vector<4x4xf32>, vector<4x128xf32>, vector<4x128xf32> -> vector<4x128xf32>
    %c1_45 = arith.constant 1 : index
    %c0_46 = arith.constant 0 : index
    %c0_47 = arith.constant 0 : index
    %84 = vector.load %arg5[%c1_45, %c0_46, %c0_47] : memref<3x4x4xf32, #tpu.memory_space<vmem>>, vector<1x4x4xf32>
    %85 = vector.shape_cast %84 : vector<1x4x4xf32> to vector<4x4xf32>
    %86 = vector.extract_strided_slice %74 {offsets = [0, 0], sizes = [4, 128], strides = [1, 1]} : vector<8x128xf32> to vector<4x128xf32>
    %cst_48 = arith.constant dense<0.000000e+00> : vector<4x128xf32>
    %87 = tpu.matmul %85, %86, %cst_48 {dimension_numbers = #tpu.dot_dimension_numbers<[1], [0], [0], [1], [0, 0, 1, 1], [], []>} : vector<4x4xf32>, vector<4x128xf32>, vector<4x128xf32> -> vector<4x128xf32>
    %88 = arith.addf %83, %87 : vector<4x128xf32>
    %c2_49 = arith.constant 2 : index
    %c0_50 = arith.constant 0 : index
    %c0_51 = arith.constant 0 : index
    %89 = vector.load %arg5[%c2_49, %c0_50, %c0_51] : memref<3x4x4xf32, #tpu.memory_space<vmem>>, vector<1x4x4xf32>
    %90 = vector.shape_cast %89 : vector<1x4x4xf32> to vector<4x4xf32>
    %91 = vector.extract_strided_slice %79 {offsets = [0, 0], sizes = [4, 128], strides = [1, 1]} : vector<8x128xf32> to vector<4x128xf32>
    %cst_52 = arith.constant dense<0.000000e+00> : vector<4x128xf32>
    %92 = tpu.matmul %90, %91, %cst_52 {dimension_numbers = #tpu.dot_dimension_numbers<[1], [0], [0], [1], [0, 0, 1, 1], [], []>} : vector<4x4xf32>, vector<4x128xf32>, vector<4x128xf32> -> vector<4x128xf32>
    %93 = arith.addf %88, %92 : vector<4x128xf32>
    %c0_53 = arith.constant 0 : index
    %c0_54 = arith.constant 0 : index
    %c0_55 = arith.constant 0 : index
    %94 = vector.load %arg5[%c0_53, %c0_54, %c0_55] : memref<3x4x4xf32, #tpu.memory_space<vmem>>, vector<1x4x4xf32>
    %95 = vector.shape_cast %94 : vector<1x4x4xf32> to vector<4x4xf32>
    %96 = vector.extract_strided_slice %72 {offsets = [4, 0], sizes = [4, 128], strides = [1, 1]} : vector<8x128xf32> to vector<4x128xf32>
    %cst_56 = arith.constant dense<0.000000e+00> : vector<4x128xf32>
    %97 = tpu.matmul %95, %96, %cst_56 {dimension_numbers = #tpu.dot_dimension_numbers<[1], [0], [0], [1], [0, 0, 1, 1], [], []>} : vector<4x4xf32>, vector<4x128xf32>, vector<4x128xf32> -> vector<4x128xf32>
    %c1_57 = arith.constant 1 : index
    %c0_58 = arith.constant 0 : index
    %c0_59 = arith.constant 0 : index
    %98 = vector.load %arg5[%c1_57, %c0_58, %c0_59] : memref<3x4x4xf32, #tpu.memory_space<vmem>>, vector<1x4x4xf32>
    %99 = vector.shape_cast %98 : vector<1x4x4xf32> to vector<4x4xf32>
    %100 = vector.extract_strided_slice %74 {offsets = [4, 0], sizes = [4, 128], strides = [1, 1]} : vector<8x128xf32> to vector<4x128xf32>
    %cst_60 = arith.constant dense<0.000000e+00> : vector<4x128xf32>
    %101 = tpu.matmul %99, %100, %cst_60 {dimension_numbers = #tpu.dot_dimension_numbers<[1], [0], [0], [1], [0, 0, 1, 1], [], []>} : vector<4x4xf32>, vector<4x128xf32>, vector<4x128xf32> -> vector<4x128xf32>
    %102 = arith.addf %97, %101 : vector<4x128xf32>
    %c2_61 = arith.constant 2 : index
    %c0_62 = arith.constant 0 : index
    %c0_63 = arith.constant 0 : index
    %103 = vector.load %arg5[%c2_61, %c0_62, %c0_63] : memref<3x4x4xf32, #tpu.memory_space<vmem>>, vector<1x4x4xf32>
    %104 = vector.shape_cast %103 : vector<1x4x4xf32> to vector<4x4xf32>
    %105 = vector.extract_strided_slice %79 {offsets = [4, 0], sizes = [4, 128], strides = [1, 1]} : vector<8x128xf32> to vector<4x128xf32>
    %cst_64 = arith.constant dense<0.000000e+00> : vector<4x128xf32>
    %106 = tpu.matmul %104, %105, %cst_64 {dimension_numbers = #tpu.dot_dimension_numbers<[1], [0], [0], [1], [0, 0, 1, 1], [], []>} : vector<4x4xf32>, vector<4x128xf32>, vector<4x128xf32> -> vector<4x128xf32>
    %107 = arith.addf %102, %106 : vector<4x128xf32>
    %108 = tpu.concatenate %93, %107 in 0 : vector<4x128xf32>, vector<4x128xf32> -> vector<8x128xf32>
    %cst_65 = arith.constant dense<0.000000e+00> : vector<8xf32>
    %109 = vector.multi_reduction <add>, %108, %cst_65 [1] : vector<8x128xf32> to vector<8xf32>
    %110 = vector.shape_cast %109 : vector<8xf32> to vector<8x1xf32>
    %111 = arith.mulf %108, %108 : vector<8x128xf32>
    %cst_66 = arith.constant dense<0.000000e+00> : vector<8xf32>
    %112 = vector.multi_reduction <add>, %111, %cst_66 [1] : vector<8x128xf32> to vector<8xf32>
    %113 = vector.shape_cast %112 : vector<8xf32> to vector<8x1xf32>
    %114 = vector.extract_strided_slice %110 {offsets = [0, 0], sizes = [4, 1], strides = [1, 1]} : vector<8x1xf32> to vector<4x1xf32>
    %115 = vector.extract_strided_slice %113 {offsets = [0, 0], sizes = [4, 1], strides = [1, 1]} : vector<8x1xf32> to vector<4x1xf32>
    %116 = vector.extract_strided_slice %110 {offsets = [4, 0], sizes = [4, 1], strides = [1, 1]} : vector<8x1xf32> to vector<4x1xf32>
    %117 = arith.addf %114, %116 : vector<4x1xf32>
    %118 = vector.extract_strided_slice %113 {offsets = [4, 0], sizes = [4, 1], strides = [1, 1]} : vector<8x1xf32> to vector<4x1xf32>
    %119 = arith.addf %115, %118 : vector<4x1xf32>
    %cst_67 = arith.constant 3.906250e-03 : f32
    %120 = vector.broadcast %cst_67 : f32 to vector<4x1xf32>
    %121 = arith.mulf %117, %120 : vector<4x1xf32>
    %cst_68 = arith.constant 3.906250e-03 : f32
    %122 = vector.broadcast %cst_68 : f32 to vector<4x1xf32>
    %123 = arith.mulf %119, %122 : vector<4x1xf32>
    %124 = arith.mulf %121, %121 : vector<4x1xf32>
    %125 = arith.subf %123, %124 : vector<4x1xf32>
    %cst_69 = arith.constant 0.000000e+00 : f32
    %126 = vector.broadcast %cst_69 : f32 to vector<4x1xf32>
    %127 = arith.maximumf %125, %126 : vector<4x1xf32>
    %c0_70 = arith.constant 0 : index
    %c0_71 = arith.constant 0 : index
    %128 = vector.load %arg6[%c0_70, %c0_71] : memref<4x1xf32, #tpu.memory_space<vmem>>, vector<4x1xf32>
    %cst_72 = arith.constant 9.99999974E-6 : f32
    %129 = vector.broadcast %cst_72 : f32 to vector<4x1xf32>
    %130 = arith.addf %127, %129 : vector<4x1xf32>
    %131 = math.rsqrt %130 : vector<4x1xf32>
    %132 = arith.mulf %128, %131 : vector<4x1xf32>
    %c0_73 = arith.constant 0 : index
    %c0_74 = arith.constant 0 : index
    %133 = vector.load %arg7[%c0_73, %c0_74] : memref<4x1xf32, #tpu.memory_space<vmem>>, vector<4x1xf32>
    %134 = arith.mulf %121, %132 : vector<4x1xf32>
    %135 = arith.subf %133, %134 : vector<4x1xf32>
    %136 = tpu.concatenate %132, %132 in 0 : vector<4x1xf32>, vector<4x1xf32> -> vector<8x1xf32>
    %137 = tpu.concatenate %135, %135 in 0 : vector<4x1xf32>, vector<4x1xf32> -> vector<8x1xf32>
    %138 = vector.broadcast %136 : vector<8x1xf32> to vector<8x128xf32>
    %139 = arith.mulf %108, %138 : vector<8x128xf32>
    %140 = vector.broadcast %137 : vector<8x1xf32> to vector<8x128xf32>
    %141 = arith.addf %139, %140 : vector<8x128xf32>
    %cst_75 = arith.constant 0.000000e+00 : f32
    %142 = vector.broadcast %cst_75 : f32 to vector<8x128xf32>
    %143 = arith.maximumf %141, %142 : vector<8x128xf32>
    %144 = arith.truncf %143 : vector<8x128xf32> to vector<8x128xbf16>
    %cst_76 = arith.constant dense<0.000000e+00> : vector<8x128xf32>
    %145 = tpu.matmul %144, %0, %cst_76 {dimension_numbers = #tpu.dot_dimension_numbers<[1], [0], [0], [1], [0, 0, 1, 1], [], []>} : vector<8x128xbf16>, vector<128x128xbf16>, vector<8x128xf32> -> vector<8x128xf32>
    %146 = arith.truncf %145 : vector<8x128xf32> to vector<8x128xbf16>
    %cst_77 = arith.constant dense<0.000000e+00> : vector<8x128xf32>
    %147 = tpu.matmul %146, %0, %cst_77 {dimension_numbers = #tpu.dot_dimension_numbers<[1], [0], [0], [1], [0, 0, 1, 1], [], []>} : vector<8x128xbf16>, vector<128x128xbf16>, vector<8x128xf32> -> vector<8x128xf32>
    %cst_78 = arith.constant 2.000000e+00 : f32
    %148 = vector.broadcast %cst_78 : f32 to vector<8x128xf32>
    %149 = arith.mulf %148, %147 : vector<8x128xf32>
    %150 = arith.subf %149, %143 : vector<8x128xf32>
    %c0_79 = arith.constant 0 : index
    %c0_80 = arith.constant 0 : index
    %c0_81 = arith.constant 0 : index
    %151 = vector.load %arg8[%c0_79, %c0_80, %c0_81] : memref<3x3x4xf32, #tpu.memory_space<vmem>>, vector<1x3x4xf32>
    %152 = vector.shape_cast %151 : vector<1x3x4xf32> to vector<3x4xf32>
    %153 = vector.extract_strided_slice %143 {offsets = [0, 0], sizes = [4, 128], strides = [1, 1]} : vector<8x128xf32> to vector<4x128xf32>
    %cst_82 = arith.constant dense<0.000000e+00> : vector<3x128xf32>
    %154 = tpu.matmul %152, %153, %cst_82 {dimension_numbers = #tpu.dot_dimension_numbers<[1], [0], [0], [1], [0, 0, 1, 1], [], []>} : vector<3x4xf32>, vector<4x128xf32>, vector<3x128xf32> -> vector<3x128xf32>
    %c1_83 = arith.constant 1 : index
    %c0_84 = arith.constant 0 : index
    %c0_85 = arith.constant 0 : index
    %155 = vector.load %arg8[%c1_83, %c0_84, %c0_85] : memref<3x3x4xf32, #tpu.memory_space<vmem>>, vector<1x3x4xf32>
    %156 = vector.shape_cast %155 : vector<1x3x4xf32> to vector<3x4xf32>
    %157 = vector.extract_strided_slice %145 {offsets = [0, 0], sizes = [4, 128], strides = [1, 1]} : vector<8x128xf32> to vector<4x128xf32>
    %cst_86 = arith.constant dense<0.000000e+00> : vector<3x128xf32>
    %158 = tpu.matmul %156, %157, %cst_86 {dimension_numbers = #tpu.dot_dimension_numbers<[1], [0], [0], [1], [0, 0, 1, 1], [], []>} : vector<3x4xf32>, vector<4x128xf32>, vector<3x128xf32> -> vector<3x128xf32>
    %159 = arith.addf %154, %158 : vector<3x128xf32>
    %c2_87 = arith.constant 2 : index
    %c0_88 = arith.constant 0 : index
    %c0_89 = arith.constant 0 : index
    %160 = vector.load %arg8[%c2_87, %c0_88, %c0_89] : memref<3x3x4xf32, #tpu.memory_space<vmem>>, vector<1x3x4xf32>
    %161 = vector.shape_cast %160 : vector<1x3x4xf32> to vector<3x4xf32>
    %162 = vector.extract_strided_slice %150 {offsets = [0, 0], sizes = [4, 128], strides = [1, 1]} : vector<8x128xf32> to vector<4x128xf32>
    %cst_90 = arith.constant dense<0.000000e+00> : vector<3x128xf32>
    %163 = tpu.matmul %161, %162, %cst_90 {dimension_numbers = #tpu.dot_dimension_numbers<[1], [0], [0], [1], [0, 0, 1, 1], [], []>} : vector<3x4xf32>, vector<4x128xf32>, vector<3x128xf32> -> vector<3x128xf32>
    %164 = arith.addf %159, %163 : vector<3x128xf32>
    %c0_91 = arith.constant 0 : index
    %c0_92 = arith.constant 0 : index
    %c0_93 = arith.constant 0 : index
    %165 = vector.load %arg8[%c0_91, %c0_92, %c0_93] : memref<3x3x4xf32, #tpu.memory_space<vmem>>, vector<1x3x4xf32>
    %166 = vector.shape_cast %165 : vector<1x3x4xf32> to vector<3x4xf32>
    %167 = vector.extract_strided_slice %143 {offsets = [4, 0], sizes = [4, 128], strides = [1, 1]} : vector<8x128xf32> to vector<4x128xf32>
    %cst_94 = arith.constant dense<0.000000e+00> : vector<3x128xf32>
    %168 = tpu.matmul %166, %167, %cst_94 {dimension_numbers = #tpu.dot_dimension_numbers<[1], [0], [0], [1], [0, 0, 1, 1], [], []>} : vector<3x4xf32>, vector<4x128xf32>, vector<3x128xf32> -> vector<3x128xf32>
    %c1_95 = arith.constant 1 : index
    %c0_96 = arith.constant 0 : index
    %c0_97 = arith.constant 0 : index
    %169 = vector.load %arg8[%c1_95, %c0_96, %c0_97] : memref<3x3x4xf32, #tpu.memory_space<vmem>>, vector<1x3x4xf32>
    %170 = vector.shape_cast %169 : vector<1x3x4xf32> to vector<3x4xf32>
    %171 = vector.extract_strided_slice %145 {offsets = [4, 0], sizes = [4, 128], strides = [1, 1]} : vector<8x128xf32> to vector<4x128xf32>
    %cst_98 = arith.constant dense<0.000000e+00> : vector<3x128xf32>
    %172 = tpu.matmul %170, %171, %cst_98 {dimension_numbers = #tpu.dot_dimension_numbers<[1], [0], [0], [1], [0, 0, 1, 1], [], []>} : vector<3x4xf32>, vector<4x128xf32>, vector<3x128xf32> -> vector<3x128xf32>
    %173 = arith.addf %168, %172 : vector<3x128xf32>
    %c2_99 = arith.constant 2 : index
    %c0_100 = arith.constant 0 : index
    %c0_101 = arith.constant 0 : index
    %174 = vector.load %arg8[%c2_99, %c0_100, %c0_101] : memref<3x3x4xf32, #tpu.memory_space<vmem>>, vector<1x3x4xf32>
    %175 = vector.shape_cast %174 : vector<1x3x4xf32> to vector<3x4xf32>
    %176 = vector.extract_strided_slice %150 {offsets = [4, 0], sizes = [4, 128], strides = [1, 1]} : vector<8x128xf32> to vector<4x128xf32>
    %cst_102 = arith.constant dense<0.000000e+00> : vector<3x128xf32>
    %177 = tpu.matmul %175, %176, %cst_102 {dimension_numbers = #tpu.dot_dimension_numbers<[1], [0], [0], [1], [0, 0, 1, 1], [], []>} : vector<3x4xf32>, vector<4x128xf32>, vector<3x128xf32> -> vector<3x128xf32>
    %178 = arith.addf %173, %177 : vector<3x128xf32>
    %179 = tpu.concatenate %164, %178 in 0 : vector<3x128xf32>, vector<3x128xf32> -> vector<6x128xf32>
    %c0_103 = arith.constant 0 : index
    %c0_104 = arith.constant 0 : index
    %180 = vector.load %arg9[%c0_103, %c0_104] : memref<3x1xf32, #tpu.memory_space<vmem>>, vector<3x1xf32>
    %181 = tpu.concatenate %180, %180 in 0 : vector<3x1xf32>, vector<3x1xf32> -> vector<6x1xf32>
    %182 = vector.broadcast %181 : vector<6x1xf32> to vector<6x128xf32>
    %183 = arith.addf %179, %182 : vector<6x128xf32>
    %cst_105 = arith.constant 0.000000e+00 : f32
    %184 = vector.broadcast %cst_105 : f32 to vector<6x128xf32>
    %185 = arith.maximumf %183, %184 : vector<6x128xf32>
    %c0_106 = arith.constant 0 : index
    %c0_107 = arith.constant 0 : index
    %186 = vector.load %arg10[%c0_106, %c0_107] : memref<6x128xf32, #tpu.memory_space<vmem>>, vector<6x128xf32>
    tpu.vector_store %arg10[%c0_106, %c0_107], %185 {strides = array<i32>} : memref<6x128xf32, #tpu.memory_space<vmem>>, vector<6x128xf32>,
    return
  }
}

</mosaic_0001>

<bundles_post_ra>
// kernel: decoder_forward.4
= control target key start
LH: loop header
LB: loop body
LE: loop exit
PB: predicated region body
PF: predicated region fallthrough
CT: control target
= control target key end

     0   :  { %vm52_vm0 = vcmask 261120   ;;  %v1426_v8 = vmov 0.0   ;;  %vm1427_vm1 = vmmov 0   ;;  %vm176_vm2 = vcmask 130048   ;;  %s1639_s1 = inlined_call_operand.vmem [shape: bf16[32,32], index: 1, kind: input, shape index: {}]   ;;  %s1640_s0 = inlined_call_operand.vmem [shape: f32[32,32], index: 0, kind: input, shape index: {}]   ;;  %s1641_s2 = inlined_call_operand.vmem [shape: f32[3,8,16], index: 2, kind: input, shape index: {}]   ;;  %s1642_s3 = inlined_call_operand.vmem [shape: f32[8,1], index: 3, kind: input, shape index: {}]   ;;  %s1643_s4 = inlined_call_operand.vmem [shape: f32[8,1], index: 4, kind: input, shape index: {}]   ;;  %s1644_s5 = inlined_call_operand.vmem [shape: f32[3,4,8], index: 5, kind: input, shape index: {}]   ;;  %s1645_s6 = inlined_call_operand.vmem [shape: f32[4,1], index: 6, kind: input, shape index: {}]   ;;  %s1646_s7 = inlined_call_operand.vmem [shape: f32[4,1], index: 7, kind: input, shape index: {}]   ;;  %s1647_s8 = inlined_call_operand.vmem [shape: f32[8,32], index: 8, kind: output, shape index: {}]  }
   0x1   :  { %v1477_v0 = vld [vmem:[%s1639_s1 + $0x8] sm:$0xff]   ;;  %v1482_v1 = vld [vmem:[%s1639_s1] sm:$0xff]   ;;  %v1502_v5 = vld [vmem:[%s1640_s0 + $0x10] sm:$0xff]  ;;  %v1428_v52 = vmov 0   ;;  %vm751_vm3 = vcmask 64512   ;;  %vm1188_vm4 = vcmask 1043456  }
   0x2   :  { %1311 = vmatprep.subr.bf16.mxu0 %v1477_v0  ;;  %v1488_v2 = vld [vmem:[%s1640_s0] sm:$0xff]  ;;  %v1493_v3 = vld [vmem:[%s1640_s0 + $0x8] sm:$0xff]  ;;  %1319 = vmatprep.subr.bf16.mxu1 %v1477_v0  ;;  %v1507_v6 = vld [vmem:[%s1640_s0 + $0x18] sm:$0xff] }
   0x3   :  { %1312 = vmatpush3.bf16.msra.mxu0 %v1477_v0  ;;  %v38_v4 = vpack.c.bf16 %v1493_v3, %v1488_v2  ;;  %1320 = vmatpush3.bf16.msra.mxu1 %v1477_v0  ;;  %v39_v7 = vpack.c.bf16 %v1507_v6, %v1502_v5  ;;  %v173_v15 = vld [vmem:[%s1641_s2] sm:$0xff]  ;;  %v1249_v16 = vld [vmem:[%s1641_s2 + $0x8] sm:$0xff]  ;;  %v1252_v31 = vld [vmem:[%s1641_s2 + $0x10] sm:$0xff] }
   0x4   :  { %1313 = vmatprep.subr.bf16.mxu0 %v1482_v1  ;;  %1321 = vmatprep.subr.bf16.mxu1 %v1482_v1 }
   0x5   :  { %1315 = vmatprep.mubr.msk.bf16.mxu0 %vm52_vm0, %v38_v4  ;;  %1418 = vset.pattern.permute.xlu0 %v1428_v52  ;;  %v635_v4 = vld [vmem:[%s1643_s4] sm:$0xff] }
   0x6   :  { %1419 = vset.pattern.permute.xlu1 %v1428_v52 }
   0x7   :  { %1314 = vmatpush3.bf16.msra.mxu0 %v1482_v1  ;;  %1322 = vmatpush3.bf16.msra.mxu1 %v1482_v1 }
   0x8   :  { %1327 = vmatprep.subr.mxu0 %v1426_v8  ;;  %1334 = vmatprep.subr.mxu1 %v1426_v8 }
   0xa   :  { %1316 = vmatmul.mubr.msk.bf16.vlgmr.msra.gmra.mxu0 %vm52_vm0, %v39_v7 }
   0xb   :  { %1331 = vmatprep.mubr.msk.f32.mxu0 %vm1427_vm1, %v1426_v8 }
  0xca   :  { %v1317_v9 = vpop.f32.mrf.mxu0 }
  0xcc   :  { %v93_v10 = vpop.f32.mrf.mxu0 }
  0xce   :  { %v1318_v11 = vpop.f32.mrf.mxu0 }
  0xcf   :  { %v109_v14 = vpack.c.bf16 %v1318_v11, %v1317_v9 }
  0xd0   :  { %v96_v12 = vpop.f32.mrf.mxu0 }
  0xd1   :  { %1328 = vmatpush3.msra.mxu0 %v96_v12  ;;  %v108_v13 = vpack.c.bf16 %v96_v12, %v93_v10 }
  0xd2   :  { %1329 = vmatprep.subr.mxu0 %v1426_v8 }
  0xd3   :  { %1323 = vmatprep.mubr.msk.bf16.mxu1 %vm52_vm0, %v108_v13  ;;  %1330 = vmatpush3.msra.mxu0 %v93_v10 }
  0xd4   :  { %1324 = vmatmul.mubr.msk.bf16.vlgmr.msra.gmra.mxu1 %vm52_vm0, %v109_v14  ;;  %1341 = vmatprep.subr.mxu0 %v1426_v8 }
  0xd5   :  { %1335 = vmatpush3.msra.mxu1 %v1493_v3  ;;  %1338 = vmatprep.mubr.msk.f32.mxu1 %vm1427_vm1, %v1426_v8 }
  0xd6   :  { %1336 = vmatprep.subr.mxu1 %v1426_v8  ;;  %1332 = vmatmul.mubr.msk.f32.vlgmr.msra.gmra.mxu0 %vm176_vm2, %v1249_v16 }
  0xd7   :  { %1337 = vmatpush3.msra.mxu1 %v1488_v2  ;;  %1345 = vmatprep.mubr.msk.f32.mxu0 %vm1427_vm1, %v1426_v8 }
  0xd8   :  { %1348 = vmatprep.subr.mxu1 %v1426_v8 }
  0xdc   :  { %1339 = vmatmul.mubr.msk.f32.vlgmr.msra.gmra.mxu1 %vm176_vm2, %v173_v15 }
  0xdd   :  { %1349 = vmatpush3.msra.mxu1 %v1318_v11  ;;  %1352 = vmatprep.mubr.msk.f32.mxu1 %vm1427_vm1, %v1426_v8 }
  0xde   :  { %1350 = vmatprep.subr.mxu1 %v1426_v8 }
  0xdf   :  { %1351 = vmatpush3.msra.mxu1 %v1317_v9 }
  0xe0   :  { %1362 = vmatprep.subr.mxu1 %v1426_v8  ;;  %1353 = vmatmul.mubr.msk.f32.vlgmr.msra.gmra.mxu1 %vm176_vm2, %v1249_v16 }
  0xe1   :  { %1366 = vmatprep.mubr.msk.f32.mxu1 %vm1427_vm1, %v1426_v8 }
 0x194   :  { %v1325_v17 = vpop.f32.mrf.mxu1 }
 0x195   :  { %v167_v20 = vmul.f32 2.0, %v1325_v17 }
 0x196   :  { %v150_v18 = vpop.f32.mrf.mxu1  ;;  %v246_v32 = vpop.f32.mrf.mxu0 }
 0x197   :  { %v165_v23 = vmul.f32 2.0, %v150_v18  ;;  %v171_v27 = vsub.f32 %v167_v20, %v1502_v5 }
 0x198   :  { %v1326_v19 = vpop.f32.mrf.mxu1  ;;  %v1333_v34 = vpop.f32.mrf.mxu0 }
 0x199   :  { %v168_v21 = vmul.f32 2.0, %v1326_v19  ;;  %v169_v30 = vsub.f32 %v165_v23, %v1488_v2  ;;  %v1259_v23 = vld [vmem:[%s1644_s5 + $0x4] sm:$0xf] }
 0x19a   :  { %v153_v22 = vpop.f32.mrf.mxu1 }
 0x19b   :  { %v172_v24 = vsub.f32 %v168_v21, %v1507_v6  ;;  %v166_v25 = vmul.f32 2.0, %v153_v22  ;;  %v748_v22 = vld [vmem:[%s1644_s5] sm:$0xf] }
 0x19c   :  { %v319_v26 = vpop.f32.mrf.mxu1 }
 0x19d   :  { %v170_v28 = vsub.f32 %v166_v25, %v1493_v3  ;;  %1363 = vmatpush3.msra.mxu1 %v172_v24  ;;  %v320_v33 = vadd.f32 %v319_v26, %v246_v32 }
 0x19e   :  { %1364 = vmatprep.subr.mxu1 %v1426_v8  ;;  %v1340_v29 = vpop.f32.mrf.mxu1 }
 0x19f   :  { %1342 = vmatpush3.msra.mxu0 %v170_v28  ;;  %1365 = vmatpush3.msra.mxu1 %v171_v27  ;;  %v1262_v28 = vld [vmem:[%s1644_s5 + $0x8] sm:$0xf] }
 0x1a0   :  { %1343 = vmatprep.subr.mxu0 %v1426_v8  ;;  %1367 = vmatmul.mubr.msk.f32.vlgmr.msra.gmra.mxu1 %vm176_vm2, %v1252_v31  ;;  %v465_v35 = vpop.f32.mrf.mxu1 }
 0x1a1   :  { %1344 = vmatpush3.msra.mxu0 %v169_v30  ;;  %1377 = vmatprep.subr.bf16.mxu1 %v1426_v8 }
 0x1a2   :  { %1346 = vmatmul.mubr.msk.f32.vlgmr.msra.gmra.mxu0 %vm176_vm2, %v1252_v31  ;;  %1355 = vmatprep.subr.mxu0 %v1426_v8  ;;  %v1354_v36 = vpop.f32.mrf.mxu1 }
 0x1a3   :  { %1356 = vmatpush3.msra.mxu0 %v1507_v6  ;;  %1359 = vmatprep.mubr.msk.f32.mxu0 %vm1427_vm1, %v1426_v8 }
 0x1a4   :  { %1357 = vmatprep.subr.mxu0 %v1426_v8  ;;  %1378 = vmatpush3.bf16.msra.mxu1 %v1477_v0 }
 0x1a5   :  { %1358 = vmatpush3.msra.mxu0 %v1502_v5  ;;  %1379 = vmatprep.subr.bf16.mxu1 %v1426_v8 }
 0x1a6   :  { %1360 = vmatmul.mubr.msk.f32.vlgmr.msra.gmra.mxu0 %vm176_vm2, %v173_v15  ;;  %1369 = vmatprep.subr.bf16.mxu0 %v1426_v8 }
 0x1a7   :  { %1370 = vmatpush3.bf16.msra.mxu0 %v1477_v0  ;;  %1373 = vmatprep.mubr.msk.bf16.mxu0 %vm1427_vm1, %v1426_v8 }
 0x1a8   :  { %1371 = vmatprep.subr.bf16.mxu0 %v1426_v8  ;;  %1380 = vmatpush3.bf16.msra.mxu1 %v1482_v1 }
 0x1a9   :  { %1381 = vmatprep.mubr.msk.bf16.mxu1 %vm1427_vm1, %v1426_v8  ;;  %1390 = vmatprep.subr.mxu1 %v1426_v8 }
 0x1ab   :  { %1372 = vmatpush3.bf16.msra.mxu0 %v1482_v1  ;;  %v631_v1 = vld [vmem:[%s1642_s3] sm:$0xff] }
 0x1ac   :  { %1385 = vmatprep.subr.mxu0 %v1426_v8 }
 0x260   :  { %v605_v37 = vpop.f32.mrf.mxu1 }
 0x262   :  { %v394_v38 = vpop.f32.mrf.mxu0  ;;  %v1368_v39 = vpop.f32.mrf.mxu1 }
 0x263   :  { %v398_v40 = vadd.f32 %v394_v38, %v320_v33 }
 0x264   :  { %v1347_v41 = vpop.f32.mrf.mxu0 }
 0x265   :  { %v610_v42 = vsel %vm52_vm0, %v398_v40, 0.0  ;;  %v616_v43 = vmul.f32 %v398_v40, %v398_v40 }
 0x266   :  { %611 = vadd.xlane.f32.xlu0 %v610_v42  ;;  %v535_v44 = vpop.f32.mrf.mxu0 }
 0x267   :  { %v536_v45 = vadd.f32 %v535_v44, %v465_v35  ;;  %v618_v46 = vsel %vm52_vm0, %v616_v43, 0.0 }
 0x268   :  { %619 = vadd.xlane.f32.xlu1 %v618_v46  ;;  %v1361_v47 = vpop.f32.mrf.mxu0 }
 0x269   :  { %v609_v48 = vadd.f32 %v605_v37, %v536_v45 }
 0x26b   :  { %v613_v49 = vsel %vm52_vm0, %v609_v48, 0.0  ;;  %v617_v50 = vmul.f32 %v609_v48, %v609_v48 }
 0x26c   :  { %614 = vadd.xlane.f32.xlu0 %v613_v49 }
 0x26d   :  { %v621_v51 = vsel %vm52_vm0, %v617_v50, 0.0 }
 0x26e   :  { %622 = vadd.xlane.f32.xlu1 %v621_v51 }
 0x2ef   :  { %v612_v53 = vpop.xlane.xlu0 %611 }
 0x2f1   :  { %v620_v54 = vpop.xlane.xlu1 %619 }
 0x2f5   :  { %v615_v55 = vpop.xlane.xlu0 %614 }
 0x2f6   :  { %v624_v56 = vadd.f32 %v615_v55, %v612_v53 }
 0x2f7   :  { %v623_v57 = vpop.xlane.xlu1 %622 }
 0x2f8   :  { %v626_v58 = vmul.f32 0.015625, %v624_v56  ;;  %v625_v59 = vadd.f32 %v623_v57, %v620_v54 }
 0x2fa   :  { %v628_v60 = vmul.f32 %v626_v58, %v626_v58  ;;  %v627_v61 = vmul.f32 0.015625, %v625_v59 }
 0x2fc   :  { %v629_v62 = vsub.f32 %v627_v61, %v628_v60 }
 0x2fe   :  { %v630_v63 = vmax.f32 %v629_v62, 0.0 }
 0x300   :  { %v632_v0 = vadd.f32 1e-05, %v630_v63 }
 0x302   :  { %1422 = vrsqrt.f32 %v632_v0 }
 0x30f   :  { %v1423_v2 = vpop.eup %1422 }
 0x310   :  { %v634_v3 = vmul.f32 %v1423_v2, %v631_v1  ;;  %v1210_v1 = vld [vmem:[%s1645_s6] sm:$0xf] }
 0x312   :  { %640 = vperm.xlu0 %1418, %v634_v3   ;;  %v636_v5 = vmul.f32 %v634_v3, %v626_v58 }
 0x314   :  { %v637_v6 = vsub.f32 %v635_v4, %v636_v5  ;;  %v1214_v4 = vld [vmem:[%s1646_s7] sm:$0xf] }
 0x316   :  { %647 = vperm.xlu1 %1419, %v637_v6  }
 0x38d   :  { %v641_v7 = vpop.permute.xlu0 %640 }
 0x38e   :  { %v643_v9 = vmul.f32 %v641_v7, %v398_v40  ;;  %v644_v10 = vmul.f32 %v641_v7, %v609_v48 }
 0x391   :  { %v648_v11 = vpop.permute.xlu1 %647 }
 0x392   :  { %v650_v12 = vadd.f32 %v648_v11, %v643_v9  ;;  %v651_v13 = vadd.f32 %v648_v11, %v644_v10 }
 0x394   :  { %v652_v14 = vmax.f32 %v650_v12, 0.0  ;;  %v653_v15 = vmax.f32 %v651_v13, 0.0 }
 0x396   :  { %v654_v16 = vpack.c.bf16 %v653_v15, %v652_v14 }
 0x398   :  { %1374 = vmatmul.mubr.msk.bf16.vlgmr.msra.gmra.mxu0 %vm52_vm0, %v654_v16 }
 0x399   :  { %1387 = vmatprep.mubr.msk.f32.mxu0 %vm1427_vm1, %v1426_v8 }
 0x458   :  { %v692_v17 = vpop.f32.mrf.mxu0 }
 0x459   :  { %1386 = vmatpush3.msra.mxu0 %v692_v17 }
 0x45a   :  { %v1375_v18 = vpop.f32.mrf.mxu0  ;;  %1395 = vmatprep.subr.mxu0 %v1426_v8  ;;  %1388 = vmatmul.mubr.msk.f32.vlgmr.msra.gmra.mxu0 %vm751_vm3, %v1259_v23 }
 0x45b   :  { %1397 = vmatprep.mubr.msk.f32.mxu0 %vm1427_vm1, %v1426_v8 }
 0x45c   :  { %v695_v19 = vpop.f32.mrf.mxu0 }
 0x45d   :  { %v699_v20 = vpack.c.bf16 %v695_v19, %v692_v17 }
 0x45e   :  { %v1376_v21 = vpop.f32.mrf.mxu0 }
 0x45f   :  { %1382 = vmatmul.mubr.msk.bf16.vlgmr.msra.gmra.mxu1 %vm52_vm0, %v699_v20 }
 0x460   :  { %1391 = vmatpush3.msra.mxu1 %v652_v14  ;;  %1392 = vmatprep.mubr.msk.f32.mxu1 %vm1427_vm1, %v1426_v8 }
 0x461   :  { %1400 = vmatprep.subr.mxu1 %v1426_v8 }
 0x467   :  { %1393 = vmatmul.mubr.msk.f32.vlgmr.msra.gmra.mxu1 %vm751_vm3, %v748_v22 }
 0x468   :  { %1401 = vmatpush3.msra.mxu1 %v695_v19  ;;  %1402 = vmatprep.mubr.msk.f32.mxu1 %vm1427_vm1, %v1426_v8 }
 0x469   :  { %1410 = vmatprep.subr.mxu1 %v1426_v8 }
 0x46b   :  { %1403 = vmatmul.mubr.msk.f32.vlgmr.msra.gmra.mxu1 %vm751_vm3, %v1259_v23 }
 0x46c   :  { %1412 = vmatprep.mubr.msk.f32.mxu1 %vm1427_vm1, %v1426_v8 }
 0x51a   :  { %v821_v35 = vpop.f32.mrf.mxu0 }
 0x51c   :  { %v1389_v37 = vpop.f32.mrf.mxu0 }
 0x51f   :  { %v737_v24 = vpop.f32.mrf.mxu1 }
 0x520   :  { %v744_v25 = vmul.f32 2.0, %v737_v24 }
 0x521   :  { %v1383_v26 = vpop.f32.mrf.mxu1 }
 0x522   :  { %v746_v27 = vsub.f32 %v744_v25, %v652_v14 }
 0x523   :  { %v740_v29 = vpop.f32.mrf.mxu1 }
 0x524   :  { %v745_v30 = vmul.f32 2.0, %v740_v29  ;;  %1396 = vmatpush3.msra.mxu0 %v746_v27 }
 0x525   :  { %v1384_v31 = vpop.f32.mrf.mxu1  ;;  %1398 = vmatmul.mubr.msk.f32.vlgmr.msra.gmra.mxu0 %vm751_vm3, %v1262_v28  ;;  %1405 = vmatprep.subr.mxu0 %v1426_v8 }
 0x526   :  { %v747_v32 = vsub.f32 %v745_v30, %v653_v15  ;;  %1406 = vmatpush3.msra.mxu0 %v653_v15  ;;  %1407 = vmatprep.mubr.msk.f32.mxu0 %vm1427_vm1, %v1426_v8 }
 0x527   :  { %v894_v33 = vpop.f32.mrf.mxu1 }
 0x528   :  { %1411 = vmatpush3.msra.mxu1 %v747_v32  ;;  %v895_v36 = vadd.f32 %v894_v33, %v821_v35 }
 0x529   :  { %1408 = vmatmul.mubr.msk.f32.vlgmr.msra.gmra.mxu0 %vm751_vm3, %v748_v22  ;;  %1413 = vmatmul.mubr.msk.f32.vlgmr.msra.gmra.mxu1 %vm751_vm3, %v1262_v28  ;;  %v1394_v34 = vpop.f32.mrf.mxu1 }
 0x52b   :  { %v1040_v38 = vpop.f32.mrf.mxu1 }
 0x52d   :  { %v1404_v39 = vpop.f32.mrf.mxu1 }
 0x5e5   :  { %v969_v40 = vpop.f32.mrf.mxu0 }
 0x5e6   :  { %v973_v47 = vadd.f32 %v969_v40, %v895_v36 }
 0x5e7   :  { %v1399_v41 = vpop.f32.mrf.mxu0 }
 0x5e9   :  { %v1110_v42 = vpop.f32.mrf.mxu0  ;;  %v1180_v43 = vpop.f32.mrf.mxu1 }
 0x5ea   :  { %v1111_v44 = vadd.f32 %v1110_v42, %v1040_v38 }
 0x5eb   :  { %v1409_v45 = vpop.f32.mrf.mxu0  ;;  %v1414_v46 = vpop.f32.mrf.mxu1 }
 0x5ec   :  { %v1184_v8 = vadd.f32 %v1180_v43, %v1111_v44 }
 0x5ee   :  { %v1186_v48 = vrot.slane %v1184_v8, 4 }
 0x5f0   :  { %v1189_v49 = vsel %vm1188_vm4, %v973_v47, %v1186_v48 }
 0x5f1   :  { %v1190_v50 = vsel %vm52_vm0, %v1189_v49, 0.0  ;;  %v1193_v51 = vmul.f32 %v1189_v49, %v1189_v49 }
 0x5f2   :  { %1191 = vadd.xlane.f32.xlu1 %v1190_v50 }
 0x5f3   :  { %v1194_v52 = vsel %vm52_vm0, %v1193_v51, 0.0 }
 0x5f4   :  { %1195 = vadd.xlane.f32.xlu0 %v1194_v52 }
 0x67b   :  { %v1192_v53 = vpop.xlane.xlu1 %1191 }
 0x67c   :  { %v1198_v54 = vrot.slane %v1192_v53, 4 }
 0x67d   :  { %v1196_v55 = vpop.xlane.xlu0 %1195 }
 0x67e   :  { %v1200_v56 = vadd.f32 %v1198_v54, %v1192_v53  ;;  %v1202_v57 = vrot.slane %v1196_v55, 4 }
 0x680   :  { %v1205_v58 = vmul.f32 0.015625, %v1200_v56  ;;  %v1204_v59 = vadd.f32 %v1202_v57, %v1196_v55 }
 0x682   :  { %v1207_v60 = vmul.f32 %v1205_v58, %v1205_v58  ;;  %v1206_v61 = vmul.f32 0.015625, %v1204_v59 }
 0x684   :  { %v1208_v62 = vsub.f32 %v1206_v61, %v1207_v60 }
 0x686   :  { %v1209_v63 = vmax.f32 %v1208_v62, 0.0 }
 0x688   :  { %v1211_v0 = vadd.f32 1e-05, %v1209_v63 }
 0x68a   :  { %1424 = vrsqrt.f32 %v1211_v0 }
 0x697   :  { %v1425_v2 = vpop.eup %1424 }
 0x698   :  { %v1213_v3 = vmul.f32 %v1425_v2, %v1210_v1 }
 0x69a   :  { %v1218_v5 = vrot.slane %v1213_v3, 4  ;;  %v1215_v6 = vmul.f32 %v1213_v3, %v1205_v58 }
 0x69c   :  { %v1220_v7 = vsel %vm1188_vm4, %v1213_v3, %v1218_v5  ;;  %v1216_v9 = vsub.f32 %v1214_v4, %v1215_v6 }
 0x69d   :  { %1227 = vperm.xlu1 %1419, %v1220_v7  }
 0x69e   :  { %v1222_v10 = vrot.slane %v1216_v9, 4 }
 0x6a0   :  { %v1224_v11 = vsel %vm1188_vm4, %v1216_v9, %v1222_v10 }
 0x6a1   :  { %1233 = vperm.xlu1 %1419, %v1224_v11  }
 0x718   :  { %v1228_v12 = vpop.permute.xlu1 %1227 }
 0x719   :  { %v1230_v13 = vmul.f32 %v1228_v12, %v1189_v49 }
 0x71c   :  { %v1234_v14 = vpop.permute.xlu1 %1233 }
 0x71d   :  { %v1236_v15 = vadd.f32 %v1234_v14, %v1230_v13 }
 0x71f   :  { %v1237_v16 = vmax.f32 %v1236_v15, 0.0 }
 0x721   :  { %1238 = vst.msk [vmem:[%s1647_s8] sm:$0xff] %vm52_vm0, %v1237_v16 }

// kernel: decoder_forward.3
= control target key start
LH: loop header
LB: loop body
LE: loop exit
PB: predicated region body
PF: predicated region fallthrough
CT: control target
= control target key end

     0   :  { %vm38_vm0 = vcmask 1043456   ;;  %v1494_v0 = vmov 0.0   ;;  %vm1495_vm1 = vmmov 0   ;;  %vm34_vm2 = vcmask 64512   ;;  %s1702_s1 = inlined_call_operand.vmem [shape: bf16[8,8], index: 1, kind: input, shape index: {}]   ;;  %s1703_s0 = inlined_call_operand.vmem [shape: f32[16,8], index: 0, kind: input, shape index: {}]   ;;  %s1704_s2 = inlined_call_operand.vmem [shape: f32[3,16,8], index: 2, kind: input, shape index: {}]   ;;  %s1705_s3 = inlined_call_operand.vmem [shape: f32[16,1], index: 3, kind: input, shape index: {}]   ;;  %s1706_s4 = inlined_call_operand.vmem [shape: f32[16,1], index: 4, kind: input, shape index: {}]   ;;  %s1707_s5 = inlined_call_operand.vmem [shape: f32[3,8,16], index: 5, kind: input, shape index: {}]   ;;  %s1708_s6 = inlined_call_operand.vmem [shape: f32[8,1], index: 6, kind: input, shape index: {}]   ;;  %s1709_s7 = inlined_call_operand.vmem [shape: f32[8,1], index: 7, kind: input, shape index: {}]   ;;  %s1710_s8 = inlined_call_operand.vmem [shape: f32[16,8], index: 8, kind: output, shape index: {}]  }
   0x1   :  { %1385 = vmatprep.subr.bf16.mxu0 %v1494_v0  ;;  %v30_v1 = vld [vmem:[%s1702_s1] sm:$0xf]  ;;  %1387 = vmatprep.mubr.msk.bf16.mxu0 %vm1495_vm1, %v1494_v0  ;;  %v32_v3 = vld [vmem:[%s1703_s0 + $0x8] sm:$0xff]  ;;  %v1311_v13 = vld [vmem:[%s1704_s2 + $0x10] sm:$0xff]  ;;  %v1496_v57 = vmov 0   ;;  %vm825_vm3 = vcmask 130048  }
   0x2   :  { %v31_v2 = vld [vmem:[%s1703_s0] sm:$0xff]  ;;  %v40_v4 = vsel %vm38_vm0, %v30_v1, 0  ;;  %1391 = vmatprep.subr.bf16.mxu1 %v1494_v0  ;;  %1393 = vmatprep.mubr.msk.bf16.mxu1 %vm1495_vm1, %v1494_v0  ;;  %v133_v12 = vld [vmem:[%s1704_s2 + $0x8] sm:$0xff]  ;;  %v1312_v14 = vld [vmem:[%s1704_s2 + $0x18] sm:$0xff] }
   0x3   :  { %v33_v5 = vpack.c.bf16 %v32_v3, %v31_v2  ;;  %1386 = vmatpush3.bf16.msra.mxu0 %v40_v4  ;;  %1392 = vmatpush3.bf16.msra.mxu1 %v40_v4  ;;  %v132_v10 = vld [vmem:[%s1704_s2] sm:$0xff]  ;;  %v1318_v21 = vld [vmem:[%s1704_s2 + $0x28] sm:$0xff] }
   0x4   :  { %1402 = vmatprep.subr.mxu1 %v31_v2  ;;  %v1317_v15 = vld [vmem:[%s1704_s2 + $0x20] sm:$0xff]  ;;  %1486 = vset.pattern.permute.xlu0 %v1496_v57 }
   0x5   :  { %1487 = vset.pattern.permute.xlu1 %v1496_v57 }
   0x6   :  { %1388 = vmatmul.mubr.msk.bf16.vlgmr.msra.gmra.mxu0 %vm34_vm2, %v33_v5 }
   0x7   :  { %1399 = vmatprep.mubr.msk.f32.mxu0 %vm34_vm2, %v1311_v13 }
  0xc6   :  { %v76_v6 = vpop.f32.mrf.mxu0 }
  0xc7   :  { %1397 = vmatprep.subr.mxu0 %v76_v6 }
  0xc8   :  { %v1389_v7 = vpop.f32.mrf.mxu0  ;;  %1398 = vmatpush3.msra.mxu0 %v76_v6 }
  0xc9   :  { %1400 = vmatmul.mubr.msk.f32.vlgmr.msra.gmra.mxu0 %vm34_vm2, %v1312_v14 }
  0xca   :  { %v79_v8 = vpop.f32.mrf.mxu0  ;;  %1409 = vmatprep.mubr.msk.f32.mxu0 %vm34_vm2, %v1317_v15 }
  0xcb   :  { %v83_v9 = vpack.c.bf16 %v79_v8, %v76_v6 }
  0xcc   :  { %v1390_v11 = vpop.f32.mrf.mxu0 }
  0xcd   :  { %1394 = vmatmul.mubr.msk.bf16.vlgmr.msra.gmra.mxu1 %vm34_vm2, %v83_v9 }
  0xce   :  { %1403 = vmatpush3.msra.mxu1 %v31_v2  ;;  %1404 = vmatprep.mubr.msk.f32.mxu1 %vm34_vm2, %v132_v10 }
  0xcf   :  { %1412 = vmatprep.subr.mxu1 %v79_v8 }
  0xd5   :  { %1405 = vmatmul.mubr.msk.f32.vlgmr.msra.gmra.mxu1 %vm34_vm2, %v133_v12 }
  0xd6   :  { %1413 = vmatpush3.msra.mxu1 %v79_v8  ;;  %1414 = vmatprep.mubr.msk.f32.mxu1 %vm34_vm2, %v1311_v13 }
  0xd9   :  { %1415 = vmatmul.mubr.msk.f32.vlgmr.msra.gmra.mxu1 %vm34_vm2, %v1312_v14 }
  0xda   :  { %1424 = vmatprep.mubr.msk.f32.mxu1 %vm34_vm2, %v1317_v15 }
 0x189   :  { %v1401_v26 = vpop.f32.mrf.mxu0 }
 0x18b   :  { %v209_v29 = vpop.f32.mrf.mxu0 }
 0x18d   :  { %v121_v16 = vpop.f32.mrf.mxu1 }
 0x18e   :  { %v128_v17 = vmul.f32 2.0, %v121_v16 }
 0x18f   :  { %v1395_v18 = vpop.f32.mrf.mxu1 }
 0x190   :  { %v130_v19 = vsub.f32 %v128_v17, %v31_v2 }
 0x191   :  { %v124_v20 = vpop.f32.mrf.mxu1 }
 0x192   :  { %v129_v22 = vmul.f32 2.0, %v124_v20  ;;  %1407 = vmatprep.subr.mxu0 %v130_v19 }
 0x193   :  { %v1396_v23 = vpop.f32.mrf.mxu1  ;;  %1408 = vmatpush3.msra.mxu0 %v130_v19  ;;  %v654_v19 = vld [vmem:[%s1705_s3] sm:$0xff] }
 0x194   :  { %v131_v24 = vsub.f32 %v129_v22, %v32_v3  ;;  %1410 = vmatmul.mubr.msk.f32.vlgmr.msra.gmra.mxu0 %vm34_vm2, %v1318_v21  ;;  %1417 = vmatprep.subr.mxu0 %v32_v3 }
 0x195   :  { %1418 = vmatpush3.msra.mxu0 %v32_v3  ;;  %1419 = vmatprep.mubr.msk.f32.mxu0 %vm34_vm2, %v132_v10  ;;  %v1406_v25 = vpop.f32.mrf.mxu1 }
 0x196   :  { %1422 = vmatprep.subr.mxu1 %v131_v24  ;;  %1481 = vmatprep.subr.msk.bf16.mxu0 %vm38_vm0, %v30_v1  ;;  %v296_v30 = vadd.f32 %v1406_v25, %v1401_v26  ;;  %v662_v26 = vld [vmem:[%s1706_s4] sm:$0xff] }
 0x197   :  { %1423 = vmatpush3.msra.mxu1 %v131_v24  ;;  %v290_v27 = vpop.f32.mrf.mxu1 }
 0x198   :  { %1420 = vmatmul.mubr.msk.f32.vlgmr.msra.gmra.mxu0 %vm34_vm2, %v133_v12  ;;  %1425 = vmatmul.mubr.msk.f32.vlgmr.msra.gmra.mxu1 %vm34_vm2, %v1318_v21  ;;  %v291_v33 = vadd.f32 %v290_v27, %v209_v29  ;;  %v655_v21 = vld [vmem:[%s1705_s3 + $0x8] sm:$0xff] }
 0x199   :  { %1428 = vmatpush3.bf16.msra.mxu0 %v40_v4  ;;  %1482 = vmatprep.subr.msk.bf16.mxu1 %vm38_vm0, %v30_v1  ;;  %v1416_v28 = vpop.f32.mrf.mxu1  ;;  %v663_v29 = vld [vmem:[%s1706_s4 + $0x8] sm:$0xff] }
 0x19a   :  { %1434 = vmatpush3.bf16.msra.mxu1 %v40_v4  ;;  %1439 = vmatprep.subr.mxu0 %v1494_v0 }
 0x19b   :  { %1446 = vmatprep.subr.mxu1 %v1494_v0  ;;  %v451_v32 = vpop.f32.mrf.mxu1 }
 0x254   :  { %v1411_v31 = vpop.f32.mrf.mxu0 }
 0x255   :  { %v1594_v34 = vadd.f32 %v1411_v31, %v296_v30 }
 0x256   :  { %v374_v35 = vpop.f32.mrf.mxu0 }
 0x257   :  { %v1596_v36 = vadd.f32 %v374_v35, %v291_v33  ;;  %v615_v37 = vsel %vm34_vm2, %v1594_v34, 0.0  ;;  %v625_v38 = vmul.f32 %v1594_v34, %v1594_v34 }
 0x258   :  { %616 = vadd.xlane.f32.xlu0 %v615_v37  ;;  %v1421_v39 = vpop.f32.mrf.mxu0  ;;  %v1426_v40 = vpop.f32.mrf.mxu1 }
 0x259   :  { %v532_v41 = vadd.f32 %v1421_v39, %v1416_v28  ;;  %v631_v42 = vsel %vm34_vm2, %v625_v38, 0.0  ;;  %v612_v46 = vsel %vm34_vm2, %v1596_v36, 0.0  ;;  %v624_v47 = vmul.f32 %v1596_v36, %v1596_v36 }
 0x25a   :  { %632 = vadd.xlane.f32.xlu1 %v631_v42  ;;  %v526_v43 = vpop.f32.mrf.mxu0  ;;  %v601_v48 = vpop.f32.mrf.mxu1 }
 0x25b   :  { %v1603_v44 = vadd.f32 %v1426_v40, %v532_v41  ;;  %v527_v45 = vadd.f32 %v526_v43, %v451_v32  ;;  %v628_v51 = vsel %vm34_vm2, %v624_v47, 0.0 }
 0x25c   :  { %613 = vadd.xlane.f32.xlu0 %v612_v46 }
 0x25d   :  { %v1609_v49 = vadd.f32 %v601_v48, %v527_v45  ;;  %v621_v50 = vsel %vm34_vm2, %v1603_v44, 0.0  ;;  %v627_v54 = vmul.f32 %v1603_v44, %v1603_v44 }
 0x25e   :  { %622 = vadd.xlane.f32.xlu1 %v621_v50 }
 0x25f   :  { %v626_v52 = vmul.f32 %v1609_v49, %v1609_v49  ;;  %v618_v53 = vsel %vm34_vm2, %v1609_v49, 0.0  ;;  %v637_v56 = vsel %vm34_vm2, %v627_v54, 0.0 }
 0x260   :  { %629 = vadd.xlane.f32.xlu0 %v628_v51 }
 0x261   :  { %v634_v55 = vsel %vm34_vm2, %v626_v52, 0.0 }
 0x262   :  { %619 = vadd.xlane.f32.xlu1 %v618_v53 }
 0x264   :  { %635 = vadd.xlane.f32.xlu0 %v634_v55  ;;  %v822_v55 = vld [vmem:[%s1707_s5] sm:$0xff] }
 0x266   :  { %638 = vadd.xlane.f32.xlu1 %v637_v56  ;;  %v1331_v56 = vld [vmem:[%s1707_s5 + $0x8] sm:$0xff] }
 0x2e1   :  { %v617_v58 = vpop.xlane.xlu0 %616 }
 0x2e3   :  { %v633_v59 = vpop.xlane.xlu1 %632 }
 0x2e5   :  { %v614_v60 = vpop.xlane.xlu0 %613 }
 0x2e7   :  { %v623_v61 = vpop.xlane.xlu1 %622 }
 0x2e8   :  { %v641_v63 = vadd.f32 %v623_v61, %v617_v58 }
 0x2e9   :  { %v630_v62 = vpop.xlane.xlu0 %629 }
 0x2ea   :  { %v645_v4 = vmul.f32 0.0625, %v641_v63 }
 0x2eb   :  { %v620_v1 = vpop.xlane.xlu1 %619 }
 0x2ec   :  { %v640_v2 = vadd.f32 %v620_v1, %v614_v60  ;;  %v649_v11 = vmul.f32 %v645_v4, %v645_v4 }
 0x2ed   :  { %v636_v3 = vpop.xlane.xlu0 %635 }
 0x2ee   :  { %v644_v5 = vmul.f32 0.0625, %v640_v2  ;;  %v642_v6 = vadd.f32 %v636_v3, %v630_v62 }
 0x2ef   :  { %v639_v7 = vpop.xlane.xlu1 %638 }
 0x2f0   :  { %v648_v8 = vmul.f32 %v644_v5, %v644_v5  ;;  %v646_v9 = vmul.f32 0.0625, %v642_v6  ;;  %v643_v10 = vadd.f32 %v639_v7, %v633_v59 }
 0x2f2   :  { %v650_v12 = vsub.f32 %v646_v9, %v648_v8  ;;  %v647_v13 = vmul.f32 0.0625, %v643_v10  ;;  %v1334_v8 = vld [vmem:[%s1707_s5 + $0x10] sm:$0xff] }
 0x2f4   :  { %v652_v14 = vmax.f32 %v650_v12, 0.0  ;;  %v651_v15 = vsub.f32 %v647_v13, %v649_v11 }
 0x2f6   :  { %v656_v16 = vadd.f32 1e-05, %v652_v14  ;;  %v653_v17 = vmax.f32 %v651_v15, 0.0 }
 0x2f8   :  { %1488 = vrsqrt.f32 %v656_v16  ;;  %v657_v18 = vadd.f32 1e-05, %v653_v17 }
 0x2fa   :  { %1490 = vrsqrt.f32 %v657_v18 }
 0x305   :  { %v1489_v20 = vpop.eup %1488 }
 0x306   :  { %v660_v22 = vmul.f32 %v1489_v20, %v654_v19 }
 0x307   :  { %v1491_v23 = vpop.eup %1490 }
 0x308   :  { %670 = vperm.xlu0 %1486, %v660_v22   ;;  %v661_v24 = vmul.f32 %v1491_v23, %v655_v21  ;;  %v664_v25 = vmul.f32 %v660_v22, %v644_v5 }
 0x30a   :  { %675 = vperm.xlu1 %1487, %v661_v24   ;;  %v666_v27 = vsub.f32 %v662_v26, %v664_v25  ;;  %v665_v28 = vmul.f32 %v661_v24, %v645_v4 }
 0x30c   :  { %v667_v30 = vsub.f32 %v663_v29, %v665_v28 }
 0x30e   :  { %684 = vperm.xlu1 %1487, %v666_v27  }
 0x312   :  { %689 = vperm.xlu1 %1487, %v667_v30  }
 0x383   :  { %v671_v32 = vpop.permute.xlu0 %670 }
 0x384   :  { %v678_v35 = vmul.f32 %v671_v32, %v1596_v36  ;;  %v680_v37 = vmul.f32 %v671_v32, %v1609_v49 }
 0x385   :  { %v676_v31 = vpop.permute.xlu1 %675 }
 0x386   :  { %v679_v38 = vmul.f32 %v676_v31, %v1594_v34  ;;  %v681_v39 = vmul.f32 %v676_v31, %v1603_v44 }
 0x389   :  { %v685_v33 = vpop.permute.xlu1 %684 }
 0x38a   :  { %v692_v40 = vadd.f32 %v685_v33, %v678_v35  ;;  %v694_v41 = vadd.f32 %v685_v33, %v680_v37 }
 0x38c   :  { %v696_v46 = vmax.f32 %v692_v40, 0.0  ;;  %v1638_v47 = vmax.f32 %v694_v41, 0.0 }
 0x38d   :  { %v690_v42 = vpop.permute.xlu1 %689 }
 0x38e   :  { %v693_v43 = vadd.f32 %v690_v42, %v679_v38  ;;  %v695_v45 = vadd.f32 %v690_v42, %v681_v39  ;;  %v1280_v42 = vld [vmem:[%s1708_s6] sm:$0xff] }
 0x390   :  { %v697_v48 = vmax.f32 %v693_v43, 0.0  ;;  %v699_v50 = vmax.f32 %v695_v45, 0.0 }
 0x392   :  { %v700_v51 = vpack.c.bf16 %v697_v48, %v696_v46  ;;  %v701_v52 = vpack.c.bf16 %v699_v50, %v1638_v47 }
 0x394   :  { %1429 = vmatprep.mubr.msk.bf16.mxu0 %vm34_vm2, %v700_v51 }
 0x395   :  { %1430 = vmatmul.mubr.msk.bf16.vlgmr.msra.gmra.mxu0 %vm34_vm2, %v701_v52 }
 0x396   :  { %1443 = vmatprep.mubr.msk.f32.mxu0 %vm1495_vm1, %v1494_v0 }
 0x455   :  { %v1431_v34 = vpop.f32.mrf.mxu0 }
 0x457   :  { %v742_v36 = vpop.f32.mrf.mxu0 }
 0x459   :  { %v1432_v44 = vpop.f32.mrf.mxu0 }
 0x45a   :  { %v758_v54 = vpack.c.bf16 %v1432_v44, %v1431_v34 }
 0x45b   :  { %v745_v49 = vpop.f32.mrf.mxu0 }
 0x45c   :  { %v757_v53 = vpack.c.bf16 %v745_v49, %v742_v36  ;;  %1440 = vmatpush3.msra.mxu0 %v745_v49 }
 0x45d   :  { %1441 = vmatprep.subr.mxu0 %v1494_v0 }
 0x45e   :  { %1435 = vmatprep.mubr.msk.bf16.mxu1 %vm34_vm2, %v757_v53  ;;  %1442 = vmatpush3.msra.mxu0 %v742_v36 }
 0x45f   :  { %1436 = vmatmul.mubr.msk.bf16.vlgmr.msra.gmra.mxu1 %vm34_vm2, %v758_v54  ;;  %1453 = vmatprep.subr.mxu0 %v1494_v0 }
 0x460   :  { %1447 = vmatpush3.msra.mxu1 %v697_v48  ;;  %1450 = vmatprep.mubr.msk.f32.mxu1 %vm1495_vm1, %v1494_v0 }
 0x461   :  { %1448 = vmatprep.subr.mxu1 %v1494_v0  ;;  %1444 = vmatmul.mubr.msk.f32.vlgmr.msra.gmra.mxu0 %vm825_vm3, %v1331_v56 }
 0x462   :  { %1449 = vmatpush3.msra.mxu1 %v696_v46  ;;  %1457 = vmatprep.mubr.msk.f32.mxu0 %vm1495_vm1, %v1494_v0 }
 0x463   :  { %1460 = vmatprep.subr.mxu1 %v1494_v0 }
 0x467   :  { %1451 = vmatmul.mubr.msk.f32.vlgmr.msra.gmra.mxu1 %vm825_vm3, %v822_v55 }
 0x468   :  { %1461 = vmatpush3.msra.mxu1 %v1432_v44  ;;  %1464 = vmatprep.mubr.msk.f32.mxu1 %vm1495_vm1, %v1494_v0 }
 0x469   :  { %1462 = vmatprep.subr.mxu1 %v1494_v0 }
 0x46a   :  { %1463 = vmatpush3.msra.mxu1 %v1431_v34 }
 0x46b   :  { %1474 = vmatprep.subr.mxu1 %v1494_v0  ;;  %1465 = vmatmul.mubr.msk.f32.vlgmr.msra.gmra.mxu1 %vm825_vm3, %v1331_v56 }
 0x46c   :  { %1478 = vmatprep.mubr.msk.f32.mxu1 %vm1495_vm1, %v1494_v0 }
 0x51f   :  { %v1437_v57 = vpop.f32.mrf.mxu1 }
 0x520   :  { %v816_v60 = vmul.f32 2.0, %v1437_v57 }
 0x521   :  { %v799_v58 = vpop.f32.mrf.mxu1  ;;  %v895_v9 = vpop.f32.mrf.mxu0 }
 0x522   :  { %v814_v63 = vmul.f32 2.0, %v799_v58  ;;  %v820_v4 = vsub.f32 %v816_v60, %v1638_v47 }
 0x523   :  { %v1438_v59 = vpop.f32.mrf.mxu1  ;;  %v1445_v11 = vpop.f32.mrf.mxu0 }
 0x524   :  { %v817_v61 = vmul.f32 2.0, %v1438_v59  ;;  %v818_v7 = vsub.f32 %v814_v63, %v696_v46  ;;  %v1284_v46 = vld [vmem:[%s1709_s7] sm:$0xff] }
 0x525   :  { %v802_v62 = vpop.f32.mrf.mxu1 }
 0x526   :  { %v821_v1 = vsub.f32 %v817_v61, %v699_v50  ;;  %v815_v2 = vmul.f32 2.0, %v802_v62 }
 0x527   :  { %v968_v3 = vpop.f32.mrf.mxu1 }
 0x528   :  { %v819_v5 = vsub.f32 %v815_v2, %v697_v48  ;;  %1475 = vmatpush3.msra.mxu1 %v821_v1  ;;  %v969_v10 = vadd.f32 %v968_v3, %v895_v9 }
 0x529   :  { %1476 = vmatprep.subr.mxu1 %v1494_v0  ;;  %v1452_v6 = vpop.f32.mrf.mxu1 }
 0x52a   :  { %1454 = vmatpush3.msra.mxu0 %v819_v5  ;;  %1477 = vmatpush3.msra.mxu1 %v820_v4 }
 0x52b   :  { %1455 = vmatprep.subr.mxu0 %v1494_v0  ;;  %1479 = vmatmul.mubr.msk.f32.vlgmr.msra.gmra.mxu1 %vm825_vm3, %v1334_v8  ;;  %v1114_v12 = vpop.f32.mrf.mxu1 }
 0x52c   :  { %1456 = vmatpush3.msra.mxu0 %v818_v7 }
 0x52d   :  { %1458 = vmatmul.mubr.msk.f32.vlgmr.msra.gmra.mxu0 %vm825_vm3, %v1334_v8  ;;  %1467 = vmatprep.subr.mxu0 %v1494_v0  ;;  %v1466_v13 = vpop.f32.mrf.mxu1 }
 0x52e   :  { %1468 = vmatpush3.msra.mxu0 %v699_v50  ;;  %1471 = vmatprep.mubr.msk.f32.mxu0 %vm1495_vm1, %v1494_v0 }
 0x52f   :  { %1469 = vmatprep.subr.mxu0 %v1494_v0 }
 0x530   :  { %1470 = vmatpush3.msra.mxu0 %v1638_v47 }
 0x531   :  { %1472 = vmatmul.mubr.msk.f32.vlgmr.msra.gmra.mxu0 %vm825_vm3, %v822_v55 }
 0x5eb   :  { %v1254_v14 = vpop.f32.mrf.mxu1 }
 0x5ed   :  { %v1043_v15 = vpop.f32.mrf.mxu0  ;;  %v1480_v16 = vpop.f32.mrf.mxu1 }
 0x5ee   :  { %v1047_v17 = vadd.f32 %v1043_v15, %v969_v10 }
 0x5ef   :  { %v1459_v18 = vpop.f32.mrf.mxu0 }
 0x5f0   :  { %v1259_v19 = vsel %vm34_vm2, %v1047_v17, 0.0  ;;  %v1265_v20 = vmul.f32 %v1047_v17, %v1047_v17 }
 0x5f1   :  { %1260 = vadd.xlane.f32.xlu1 %v1259_v19  ;;  %v1184_v21 = vpop.f32.mrf.mxu0 }
 0x5f2   :  { %v1185_v0 = vadd.f32 %v1184_v21, %v1114_v12  ;;  %v1267_v24 = vsel %vm34_vm2, %v1265_v20, 0.0 }
 0x5f3   :  { %v1473_v22 = vpop.f32.mrf.mxu0 }
 0x5f4   :  { %v1258_v23 = vadd.f32 %v1254_v14, %v1185_v0 }
 0x5f5   :  { %1268 = vadd.xlane.f32.xlu1 %v1267_v24 }
 0x5f6   :  { %v1262_v25 = vsel %vm34_vm2, %v1258_v23, 0.0  ;;  %v1266_v26 = vmul.f32 %v1258_v23, %v1258_v23 }
 0x5f7   :  { %1263 = vadd.xlane.f32.xlu0 %v1262_v25 }
 0x5f8   :  { %v1270_v27 = vsel %vm34_vm2, %v1266_v26, 0.0 }
 0x5f9   :  { %1271 = vadd.xlane.f32.xlu1 %v1270_v27 }
 0x67a   :  { %v1261_v28 = vpop.xlane.xlu1 %1260 }
 0x67e   :  { %v1269_v29 = vpop.xlane.xlu1 %1268 }
 0x680   :  { %v1264_v30 = vpop.xlane.xlu0 %1263 }
 0x681   :  { %v1273_v31 = vadd.f32 %v1264_v30, %v1261_v28 }
 0x682   :  { %v1272_v32 = vpop.xlane.xlu1 %1271 }
 0x683   :  { %v1275_v33 = vmul.f32 0.0625, %v1273_v31  ;;  %v1274_v35 = vadd.f32 %v1272_v32, %v1269_v29 }
 0x685   :  { %v1277_v37 = vmul.f32 %v1275_v33, %v1275_v33  ;;  %v1276_v38 = vmul.f32 0.0625, %v1274_v35 }
 0x687   :  { %v1278_v39 = vsub.f32 %v1276_v38, %v1277_v37 }
 0x689   :  { %v1279_v40 = vmax.f32 %v1278_v39, 0.0 }
 0x68b   :  { %v1281_v41 = vadd.f32 1e-05, %v1279_v40 }
 0x68d   :  { %1492 = vrsqrt.f32 %v1281_v41 }
 0x69a   :  { %v1493_v43 = vpop.eup %1492 }
 0x69b   :  { %v1283_v45 = vmul.f32 %v1493_v43, %v1280_v42 }
 0x69d   :  { %1289 = vperm.xlu1 %1487, %v1283_v45   ;;  %v1285_v47 = vmul.f32 %v1283_v45, %v1275_v33 }
 0x69f   :  { %v1286_v48 = vsub.f32 %v1284_v46, %v1285_v47 }
 0x6a1   :  { %1296 = vperm.xlu0 %1486, %v1286_v48  }
 0x718   :  { %v1290_v50 = vpop.permute.xlu1 %1289 }
 0x719   :  { %v1292_v51 = vmul.f32 %v1290_v50, %v1047_v17  ;;  %v1293_v52 = vmul.f32 %v1290_v50, %v1258_v23 }
 0x71c   :  { %v1297_v34 = vpop.permute.xlu0 %1296 }
 0x71d   :  { %v1299_v36 = vadd.f32 %v1297_v34, %v1292_v51  ;;  %v1300_v44 = vadd.f32 %v1297_v34, %v1293_v52 }
 0x71f   :  { %v1301_v49 = vmax.f32 %v1299_v36, 0.0  ;;  %v1302_v53 = vmax.f32 %v1300_v44, 0.0 }
 0x721   :  { %1303 = vst.msk [vmem:[%s1710_s8] sm:$0xff] %vm34_vm2, %v1301_v49  ;;  %1304 = vst.msk [vmem:[%s1710_s8 + $0x8] sm:$0xff] %vm34_vm2, %v1302_v53 }

// kernel: decoder_forward.5
= control target key start
LH: loop header
LB: loop body
LE: loop exit
PB: predicated region body
PF: predicated region fallthrough
CT: control target
= control target key end

     0   :  { %v2188_v0 = vmov 0.0   ;;  %vm2189_vm0 = vmmov 0   ;;  %vm193_vm1 = vcmask 64512   ;;  %vm630_vm2 = vcmask 1043456   ;;  %s2537_s1 = inlined_call_operand.vmem [shape: bf16[128,128], index: 1, kind: input, shape index: {}]   ;;  %s2538_s0 = inlined_call_operand.vmem [shape: f32[16,128], index: 0, kind: input, shape index: {}]   ;;  %s2539_s2 = inlined_call_operand.vmem [shape: f32[3,4,8], index: 2, kind: input, shape index: {}]   ;;  %s2540_s3 = inlined_call_operand.vmem [shape: f32[4,1], index: 3, kind: input, shape index: {}]   ;;  %s2541_s4 = inlined_call_operand.vmem [shape: f32[4,1], index: 4, kind: input, shape index: {}]   ;;  %s2542_s5 = inlined_call_operand.vmem [shape: f32[3,4,4], index: 5, kind: input, shape index: {}]   ;;  %s2543_s6 = inlined_call_operand.vmem [shape: f32[4,1], index: 6, kind: input, shape index: {}]   ;;  %s2544_s9 = inlined_call_operand.vmem [shape: f32[3,1], index: 9, kind: input, shape index: {}]   ;;  %s2545_s7 = inlined_call_operand.vmem [shape: f32[4,1], index: 7, kind: input, shape index: {}]   ;;  %s2546_s8 = inlined_call_operand.vmem [shape: f32[3,3,4], index: 8, kind: input, shape index: {}]   ;;  %s2547_s10 = inlined_call_operand.vmem [shape: f32[6,128], index: 10, kind: output, shape index: {}]  }
   0x1   :  { %1961 = vmatprep.subr.bf16.mxu0 %v2188_v0  ;;  %v2250_v1 = vld [vmem:[%s2537_s1 + $0x38] sm:$0xff]   ;;  %1977 = vmatprep.mubr.msk.bf16.mxu0 %vm2189_vm0, %v2188_v0  ;;  %v2261_v2 = vld [vmem:[%s2537_s1 + $0x30] sm:$0xff]   ;;  %v2270_v3 = vld [vmem:[%s2537_s1 + $0x28] sm:$0xff]   ;;  %v2190_v47 = vmov 0   ;;  %vm765_vm3 = vcmask 31744   ;;  %vm1808_vm4 = vcmask 1042432  }
   0x2   :  { %1981 = vmatprep.subr.bf16.mxu1 %v2188_v0  ;;  %1997 = vmatprep.mubr.msk.bf16.mxu1 %vm2189_vm0, %v2188_v0  ;;  %v2279_v4 = vld [vmem:[%s2537_s1 + $0x20] sm:$0xff]   ;;  %v2288_v5 = vld [vmem:[%s2537_s1 + $0x18] sm:$0xff]   ;;  %v2297_v6 = vld [vmem:[%s2537_s1 + $0x10] sm:$0xff]  }
   0x3   :  { %1962 = vmatpush3.bf16.msra.mxu0 %v2250_v1  ;;  %1982 = vmatpush3.bf16.msra.mxu1 %v2250_v1  ;;  %v2306_v7 = vld [vmem:[%s2537_s1 + $0x8] sm:$0xff]   ;;  %v2315_v8 = vld [vmem:[%s2537_s1] sm:$0xff]  }
   0x4   :  { %1963 = vmatprep.subr.bf16.mxu0 %v2188_v0  ;;  %1983 = vmatprep.subr.bf16.mxu1 %v2188_v0  ;;  %v52_v9 = vld [vmem:[%s2538_s0] sm:$0xff]  ;;  %v53_v10 = vld [vmem:[%s2538_s0 + $0x8] sm:$0xff] }
   0x5   :  { %v54_v11 = vpack.c.bf16 %v53_v10, %v52_v9  ;;  %v190_v17 = vld [vmem:[%s2539_s2] sm:$0xf]  ;;  %v1835_v18 = vld [vmem:[%s2539_s2 + $0x4] sm:$0xf]  ;;  %v1838_v23 = vld [vmem:[%s2539_s2 + $0x8] sm:$0xf]  ;;  %2174 = vset.pattern.permute.xlu1 %v2190_v47  ;;  %2175 = vset.pattern.permute.xlu0 %v2190_v47 }
   0x6   :  { %v650_v60 = vld [vmem:[%s2540_s3] sm:$0xf] }
   0x7   :  { %1964 = vmatpush3.bf16.msra.mxu0 %v2261_v2  ;;  %1984 = vmatpush3.bf16.msra.mxu1 %v2261_v2  ;;  %v654_v63 = vld [vmem:[%s2541_s4] sm:$0xf] }
   0x8   :  { %1965 = vmatprep.subr.bf16.mxu0 %v2188_v0  ;;  %1985 = vmatprep.subr.bf16.mxu1 %v2188_v0 }
   0xb   :  { %1966 = vmatpush3.bf16.msra.mxu0 %v2270_v3  ;;  %1986 = vmatpush3.bf16.msra.mxu1 %v2270_v3 }
   0xc   :  { %1967 = vmatprep.subr.bf16.mxu0 %v2188_v0  ;;  %1987 = vmatprep.subr.bf16.mxu1 %v2188_v0 }
   0xf   :  { %1968 = vmatpush3.bf16.msra.mxu0 %v2279_v4  ;;  %1988 = vmatpush3.bf16.msra.mxu1 %v2279_v4 }
  0x10   :  { %1969 = vmatprep.subr.bf16.mxu0 %v2188_v0  ;;  %1989 = vmatprep.subr.bf16.mxu1 %v2188_v0 }
  0x13   :  { %1970 = vmatpush3.bf16.msra.mxu0 %v2288_v5  ;;  %1990 = vmatpush3.bf16.msra.mxu1 %v2288_v5 }
  0x14   :  { %1971 = vmatprep.subr.bf16.mxu0 %v2188_v0  ;;  %1991 = vmatprep.subr.bf16.mxu1 %v2188_v0 }
  0x17   :  { %1972 = vmatpush3.bf16.msra.mxu0 %v2297_v6  ;;  %1992 = vmatpush3.bf16.msra.mxu1 %v2297_v6 }
  0x18   :  { %1973 = vmatprep.subr.bf16.mxu0 %v2188_v0  ;;  %1993 = vmatprep.subr.bf16.mxu1 %v2188_v0 }
  0x1b   :  { %1974 = vmatpush3.bf16.msra.mxu0 %v2306_v7  ;;  %1994 = vmatpush3.bf16.msra.mxu1 %v2306_v7 }
  0x1c   :  { %1975 = vmatprep.subr.bf16.mxu0 %v2188_v0  ;;  %1995 = vmatprep.subr.bf16.mxu1 %v2188_v0 }
  0x1f   :  { %1976 = vmatpush3.bf16.msra.mxu0 %v2315_v8  ;;  %1996 = vmatpush3.bf16.msra.mxu1 %v2315_v8 }
  0x20   :  { %2001 = vmatprep.subr.mxu0 %v2188_v0  ;;  %2006 = vmatprep.subr.mxu1 %v2188_v0 }
  0x22   :  { %1978 = vmatmul.mubr.bf16.vlgmr.msra.gmra.mxu0 %v54_v11 }
  0x23   :  { %2003 = vmatprep.mubr.msk.f32.mxu0 %vm2189_vm0, %v2188_v0 }
  0xe2   :  { %v137_v12 = vpop.f32.mrf.mxu0 }
  0xe3   :  { %2002 = vmatpush3.msra.mxu0 %v137_v12 }
  0xe4   :  { %v1979_v13 = vpop.f32.mrf.mxu0  ;;  %2011 = vmatprep.subr.mxu0 %v2188_v0  ;;  %2004 = vmatmul.mubr.msk.f32.vlgmr.msra.gmra.mxu0 %vm193_vm1, %v1835_v18 }
  0xe5   :  { %2013 = vmatprep.mubr.msk.f32.mxu0 %vm2189_vm0, %v2188_v0 }
  0xe6   :  { %v140_v14 = vpop.f32.mrf.mxu0 }
  0xe7   :  { %v144_v15 = vpack.c.bf16 %v140_v14, %v137_v12 }
  0xe8   :  { %v1980_v16 = vpop.f32.mrf.mxu0 }
  0xe9   :  { %1998 = vmatmul.mubr.bf16.vlgmr.msra.gmra.mxu1 %v144_v15 }
  0xea   :  { %2007 = vmatpush3.msra.mxu1 %v52_v9  ;;  %2008 = vmatprep.mubr.msk.f32.mxu1 %vm2189_vm0, %v2188_v0 }
  0xeb   :  { %2016 = vmatprep.subr.mxu1 %v2188_v0 }
  0xf1   :  { %2009 = vmatmul.mubr.msk.f32.vlgmr.msra.gmra.mxu1 %vm193_vm1, %v190_v17 }
  0xf2   :  { %2017 = vmatpush3.msra.mxu1 %v140_v14  ;;  %2018 = vmatprep.mubr.msk.f32.mxu1 %vm2189_vm0, %v2188_v0 }
  0xf3   :  { %2026 = vmatprep.subr.mxu1 %v2188_v0 }
  0xf5   :  { %2019 = vmatmul.mubr.msk.f32.vlgmr.msra.gmra.mxu1 %vm193_vm1, %v1835_v18 }
  0xf6   :  { %2028 = vmatprep.mubr.msk.f32.mxu1 %vm2189_vm0, %v2188_v0 }
 0x1a4   :  { %v263_v30 = vpop.f32.mrf.mxu0 }
 0x1a6   :  { %v2005_v32 = vpop.f32.mrf.mxu0 }
 0x1a9   :  { %v179_v19 = vpop.f32.mrf.mxu1 }
 0x1aa   :  { %v186_v20 = vmul.f32 2.0, %v179_v19 }
 0x1ab   :  { %v1999_v21 = vpop.f32.mrf.mxu1 }
 0x1ac   :  { %v188_v22 = vsub.f32 %v186_v20, %v52_v9 }
 0x1ad   :  { %v182_v24 = vpop.f32.mrf.mxu1 }
 0x1ae   :  { %v187_v25 = vmul.f32 2.0, %v182_v24  ;;  %2012 = vmatpush3.msra.mxu0 %v188_v22 }
 0x1af   :  { %v2000_v26 = vpop.f32.mrf.mxu1  ;;  %2014 = vmatmul.mubr.msk.f32.vlgmr.msra.gmra.mxu0 %vm193_vm1, %v1838_v23  ;;  %2021 = vmatprep.subr.mxu0 %v2188_v0 }
 0x1b0   :  { %v189_v27 = vsub.f32 %v187_v25, %v53_v10  ;;  %2022 = vmatpush3.msra.mxu0 %v53_v10  ;;  %2023 = vmatprep.mubr.msk.f32.mxu0 %vm2189_vm0, %v2188_v0  ;;  %v762_v26 = vld [vmem:[%s2542_s5] sm:$0xf] }
 0x1b1   :  { %v336_v28 = vpop.f32.mrf.mxu1  ;;  %2031 = vmatprep.subr.bf16.mxu0 %v2188_v0 }
 0x1b2   :  { %2027 = vmatpush3.msra.mxu1 %v189_v27  ;;  %v337_v31 = vadd.f32 %v336_v28, %v263_v30  ;;  %v1843_v28 = vld [vmem:[%s2542_s5 + $0x4] sm:$0xf] }
 0x1b3   :  { %2024 = vmatmul.mubr.msk.f32.vlgmr.msra.gmra.mxu0 %vm193_vm1, %v190_v17  ;;  %2029 = vmatmul.mubr.msk.f32.vlgmr.msra.gmra.mxu1 %vm193_vm1, %v1838_v23  ;;  %v2010_v29 = vpop.f32.mrf.mxu1 }
 0x1b4   :  { %2032 = vmatpush3.bf16.msra.mxu0 %v2250_v1  ;;  %2047 = vmatprep.mubr.msk.bf16.mxu0 %vm2189_vm0, %v2188_v0 }
 0x1b5   :  { %2033 = vmatprep.subr.bf16.mxu0 %v2188_v0  ;;  %2051 = vmatprep.subr.bf16.mxu1 %v2188_v0  ;;  %v482_v33 = vpop.f32.mrf.mxu1 }
 0x1b6   :  { %2052 = vmatpush3.bf16.msra.mxu1 %v2250_v1  ;;  %2067 = vmatprep.mubr.msk.bf16.mxu1 %vm2189_vm0, %v2188_v0 }
 0x1b7   :  { %2053 = vmatprep.subr.bf16.mxu1 %v2188_v0  ;;  %v2020_v34 = vpop.f32.mrf.mxu1 }
 0x1b8   :  { %2034 = vmatpush3.bf16.msra.mxu0 %v2261_v2 }
 0x1b9   :  { %2035 = vmatprep.subr.bf16.mxu0 %v2188_v0 }
 0x1ba   :  { %2054 = vmatpush3.bf16.msra.mxu1 %v2261_v2 }
 0x1bb   :  { %2055 = vmatprep.subr.bf16.mxu1 %v2188_v0 }
 0x1bc   :  { %2036 = vmatpush3.bf16.msra.mxu0 %v2270_v3 }
 0x1bd   :  { %2037 = vmatprep.subr.bf16.mxu0 %v2188_v0 }
 0x1be   :  { %2056 = vmatpush3.bf16.msra.mxu1 %v2270_v3 }
 0x1bf   :  { %2057 = vmatprep.subr.bf16.mxu1 %v2188_v0 }
 0x1c0   :  { %2038 = vmatpush3.bf16.msra.mxu0 %v2279_v4 }
 0x1c1   :  { %2039 = vmatprep.subr.bf16.mxu0 %v2188_v0 }
 0x1c2   :  { %2058 = vmatpush3.bf16.msra.mxu1 %v2279_v4 }
 0x1c3   :  { %2059 = vmatprep.subr.bf16.mxu1 %v2188_v0 }
 0x1c4   :  { %2040 = vmatpush3.bf16.msra.mxu0 %v2288_v5 }
 0x1c5   :  { %2041 = vmatprep.subr.bf16.mxu0 %v2188_v0 }
 0x1c6   :  { %2060 = vmatpush3.bf16.msra.mxu1 %v2288_v5 }
 0x1c7   :  { %2061 = vmatprep.subr.bf16.mxu1 %v2188_v0 }
 0x1c8   :  { %2042 = vmatpush3.bf16.msra.mxu0 %v2297_v6 }
 0x1c9   :  { %2043 = vmatprep.subr.bf16.mxu0 %v2188_v0 }
 0x1ca   :  { %2062 = vmatpush3.bf16.msra.mxu1 %v2297_v6 }
 0x1cb   :  { %2063 = vmatprep.subr.bf16.mxu1 %v2188_v0 }
 0x1cc   :  { %2044 = vmatpush3.bf16.msra.mxu0 %v2306_v7 }
 0x1cd   :  { %2045 = vmatprep.subr.bf16.mxu0 %v2188_v0 }
 0x1ce   :  { %2064 = vmatpush3.bf16.msra.mxu1 %v2306_v7 }
 0x1cf   :  { %2065 = vmatprep.subr.bf16.mxu1 %v2188_v0 }
 0x1d0   :  { %2046 = vmatpush3.bf16.msra.mxu0 %v2315_v8 }
 0x1d1   :  { %2071 = vmatprep.subr.mxu0 %v2188_v0 }
 0x1d2   :  { %2066 = vmatpush3.bf16.msra.mxu1 %v2315_v8 }
 0x1d3   :  { %2076 = vmatprep.subr.mxu1 %v2188_v0 }
 0x26f   :  { %v411_v35 = vpop.f32.mrf.mxu0 }
 0x270   :  { %v415_v43 = vadd.f32 %v411_v35, %v337_v31 }
 0x271   :  { %v2015_v36 = vpop.f32.mrf.mxu0 }
 0x273   :  { %v552_v37 = vpop.f32.mrf.mxu0  ;;  %v622_v38 = vpop.f32.mrf.mxu1 }
 0x274   :  { %v553_v39 = vadd.f32 %v552_v37, %v482_v33  ;;  %v1848_v33 = vld [vmem:[%s2542_s5 + $0x8] sm:$0xf] }
 0x275   :  { %v2025_v40 = vpop.f32.mrf.mxu0  ;;  %v2030_v41 = vpop.f32.mrf.mxu1 }
 0x276   :  { %v626_v42 = vadd.f32 %v622_v38, %v553_v39 }
 0x278   :  { %v628_v44 = vrot.slane %v626_v42, 4 }
 0x27a   :  { %v631_v45 = vsel %vm630_vm2, %v415_v43, %v628_v44 }
 0x27b   :  { %632 = vadd.xlane.f32.xlu0 %v631_v45  ;;  %v634_v46 = vmul.f32 %v631_v45, %v631_v45 }
 0x27f   :  { %635 = vadd.xlane.f32.xlu0 %v634_v46 }
 0x304   :  { %v633_v48 = vpop.xlane.xlu0 %632 }
 0x305   :  { %v638_v49 = vrot.slane %v633_v48, 4 }
 0x307   :  { %v640_v50 = vadd.f32 %v638_v49, %v633_v48 }
 0x308   :  { %v636_v51 = vpop.xlane.xlu0 %635 }
 0x309   :  { %v645_v52 = vmul.f32 0.00390625, %v640_v50  ;;  %v642_v53 = vrot.slane %v636_v51, 4 }
 0x30b   :  { %v644_v54 = vadd.f32 %v642_v53, %v636_v51  ;;  %v647_v55 = vmul.f32 %v645_v52, %v645_v52 }
 0x30d   :  { %v646_v56 = vmul.f32 0.00390625, %v644_v54 }
 0x30f   :  { %v648_v57 = vsub.f32 %v646_v56, %v647_v55 }
 0x311   :  { %v649_v58 = vmax.f32 %v648_v57, 0.0 }
 0x313   :  { %v651_v59 = vadd.f32 1e-05, %v649_v58 }
 0x315   :  { %2184 = vrsqrt.f32 %v651_v59 }
 0x322   :  { %v2185_v61 = vpop.eup %2184 }
 0x323   :  { %v653_v62 = vmul.f32 %v2185_v61, %v650_v60  ;;  %v1239_v61 = vld [vmem:[%s2543_s6] sm:$0xf] }
 0x325   :  { %v658_v9 = vrot.slane %v653_v62, 4  ;;  %v655_v10 = vmul.f32 %v653_v62, %v645_v52 }
 0x327   :  { %v660_v11 = vsel %vm630_vm2, %v653_v62, %v658_v9  ;;  %v656_v12 = vsub.f32 %v654_v63, %v655_v10  ;;  %v1810_v63 = vld [vmem:[%s2544_s9] sm:$0x7] }
 0x328   :  { %667 = vperm.xlu1 %2174, %v660_v11   ;;  %v1243_v10 = vld [vmem:[%s2545_s7] sm:$0xf] }
 0x329   :  { %v662_v13 = vrot.slane %v656_v12, 4 }
 0x32b   :  { %v664_v14 = vsel %vm630_vm2, %v656_v12, %v662_v13  ;;  %v1812_v12 = vrot.slane %v1810_v63, 5 }
 0x32c   :  { %673 = vperm.xlu1 %2174, %v664_v14  }
 0x3a3   :  { %v668_v15 = vpop.permute.xlu1 %667 }
 0x3a4   :  { %v670_v16 = vmul.f32 %v668_v15, %v631_v45 }
 0x3a7   :  { %v674_v17 = vpop.permute.xlu1 %673 }
 0x3a8   :  { %v676_v18 = vadd.f32 %v674_v17, %v670_v16  ;;  %v1814_v16 = vsel %vm1808_vm4, %v1810_v63, %v1812_v12 }
 0x3aa   :  { %v677_v19 = vmax.f32 %v676_v18, 0.0 }
 0x3ac   :  { %v678_v20 = vpack.c.bf16 %v677_v19, %v677_v19  ;;  %v1070_v35 = vrot.slane %v677_v19, 4 }
 0x3ae   :  { %2048 = vmatmul.mubr.bf16.vlgmr.msra.gmra.mxu0 %v678_v20 }
 0x3af   :  { %2073 = vmatprep.mubr.msk.f32.mxu0 %vm2189_vm0, %v2188_v0 }
 0x46e   :  { %v713_v21 = vpop.f32.mrf.mxu0 }
 0x46f   :  { %v719_v22 = vpack.c.bf16 %v713_v21, %v713_v21  ;;  %2072 = vmatpush3.msk.msra.mxu0 %vm630_vm2, %v713_v21  ;;  %v997_v27 = vrot.slane %v713_v21, 4 }
 0x470   :  { %v2049_v23 = vpop.f32.mrf.mxu0  ;;  %2081 = vmatprep.subr.mxu0 %v2188_v0  ;;  %2074 = vmatmul.mubr.msk.f32.vlgmr.msra.gmra.mxu0 %vm765_vm3, %v1843_v28 }
 0x471   :  { %2068 = vmatmul.mubr.bf16.vlgmr.msra.gmra.mxu1 %v719_v22  ;;  %2083 = vmatprep.mubr.msk.f32.mxu0 %vm2189_vm0, %v2188_v0 }
 0x472   :  { %2077 = vmatpush3.msk.msra.mxu1 %vm630_vm2, %v677_v19  ;;  %v716_v24 = vpop.f32.mrf.mxu0  ;;  %2078 = vmatprep.mubr.msk.f32.mxu1 %vm2189_vm0, %v2188_v0 }
 0x473   :  { %2086 = vmatprep.subr.mxu1 %v2188_v0 }
 0x474   :  { %v2050_v25 = vpop.f32.mrf.mxu0 }
 0x479   :  { %2079 = vmatmul.mubr.msk.f32.vlgmr.msra.gmra.mxu1 %vm765_vm3, %v762_v26 }
 0x47a   :  { %2087 = vmatpush3.msk.msra.mxu1 %vm630_vm2, %v997_v27  ;;  %2088 = vmatprep.mubr.msk.f32.mxu1 %vm2189_vm0, %v2188_v0 }
 0x47b   :  { %2096 = vmatprep.subr.mxu1 %v2188_v0 }
 0x47d   :  { %2089 = vmatmul.mubr.msk.f32.vlgmr.msra.gmra.mxu1 %vm765_vm3, %v1843_v28 }
 0x47e   :  { %2098 = vmatprep.mubr.msk.f32.mxu1 %vm2189_vm0, %v2188_v0 }
 0x531   :  { %v754_v29 = vpop.f32.mrf.mxu1 }
 0x532   :  { %v760_v30 = vmul.f32 2.0, %v754_v29 }
 0x533   :  { %v2069_v31 = vpop.f32.mrf.mxu1 }
 0x534   :  { %v761_v32 = vsub.f32 %v760_v30, %v677_v19  ;;  %v1351_v30 = vld [vmem:[%s2546_s8] sm:$0x7] }
 0x535   :  { %v757_v34 = vpop.f32.mrf.mxu1 }
 0x536   :  { %v1143_v36 = vrot.slane %v761_v32, 4  ;;  %2082 = vmatpush3.msk.msra.mxu0 %vm630_vm2, %v761_v32  ;;  %v1857_v32 = vld [vmem:[%s2546_s8 + $0x4] sm:$0x7] }
 0x537   :  { %v2070_v37 = vpop.f32.mrf.mxu1  ;;  %2084 = vmatmul.mubr.msk.f32.vlgmr.msra.gmra.mxu0 %vm765_vm3, %v1848_v33  ;;  %2091 = vmatprep.subr.mxu0 %v2188_v0 }
 0x538   :  { %2092 = vmatpush3.msk.msra.mxu0 %vm630_vm2, %v1070_v35  ;;  %2097 = vmatpush3.msk.msra.mxu1 %vm630_vm2, %v1143_v36  ;;  %v1862_v37 = vld [vmem:[%s2546_s8 + $0x8] sm:$0x7] }
 0x539   :  { %2093 = vmatprep.mubr.msk.f32.mxu0 %vm2189_vm0, %v2188_v0  ;;  %2099 = vmatmul.mubr.msk.f32.vlgmr.msra.gmra.mxu1 %vm765_vm3, %v1848_v33  ;;  %v914_v38 = vpop.f32.mrf.mxu1 }
 0x53a   :  { %2101 = vmatprep.subr.bf16.mxu0 %v2188_v0  ;;  %2121 = vmatprep.subr.bf16.mxu1 %v2188_v0 }
 0x53b   :  { %2094 = vmatmul.mubr.msk.f32.vlgmr.msra.gmra.mxu0 %vm765_vm3, %v762_v26  ;;  %v2080_v39 = vpop.f32.mrf.mxu1  ;;  %2122 = vmatpush3.bf16.msra.mxu1 %v2250_v1 }
 0x53c   :  { %2102 = vmatpush3.bf16.msra.mxu0 %v2250_v1  ;;  %2117 = vmatprep.mubr.msk.bf16.mxu0 %vm2189_vm0, %v2188_v0  ;;  %v838_v1 = vpop.f32.mrf.mxu0 }
 0x53d   :  { %2103 = vmatprep.subr.bf16.mxu0 %v2188_v0  ;;  %2123 = vmatprep.subr.bf16.mxu1 %v2188_v0 }
 0x53e   :  { %2137 = vmatprep.mubr.msk.bf16.mxu1 %vm2189_vm0, %v2188_v0 }
 0x53f   :  { %2124 = vmatpush3.bf16.msra.mxu1 %v2261_v2 }
 0x540   :  { %2104 = vmatpush3.bf16.msra.mxu0 %v2261_v2  ;;  %2125 = vmatprep.subr.bf16.mxu1 %v2188_v0  ;;  %v915_v2 = vadd.f32 %v914_v38, %v838_v1 }
 0x541   :  { %2105 = vmatprep.subr.bf16.mxu0 %v2188_v0 }
 0x543   :  { %2126 = vmatpush3.bf16.msra.mxu1 %v2270_v3 }
 0x544   :  { %2106 = vmatpush3.bf16.msra.mxu0 %v2270_v3  ;;  %2127 = vmatprep.subr.bf16.mxu1 %v2188_v0  ;;  %v2075_v3 = vpop.f32.mrf.mxu0 }
 0x545   :  { %2107 = vmatprep.subr.bf16.mxu0 %v2188_v0 }
 0x547   :  { %2128 = vmatpush3.bf16.msra.mxu1 %v2279_v4 }
 0x548   :  { %2108 = vmatpush3.bf16.msra.mxu0 %v2279_v4  ;;  %2129 = vmatprep.subr.bf16.mxu1 %v2188_v0  ;;  %v1066_v4 = vpop.f32.mrf.mxu1 }
 0x549   :  { %2109 = vmatprep.subr.bf16.mxu0 %v2188_v0 }
 0x54b   :  { %2130 = vmatpush3.bf16.msra.mxu1 %v2288_v5 }
 0x54c   :  { %2110 = vmatpush3.bf16.msra.mxu0 %v2288_v5  ;;  %2131 = vmatprep.subr.bf16.mxu1 %v2188_v0  ;;  %v2090_v5 = vpop.f32.mrf.mxu1 }
 0x54d   :  { %2111 = vmatprep.subr.bf16.mxu0 %v2188_v0 }
 0x54f   :  { %2132 = vmatpush3.bf16.msra.mxu1 %v2297_v6 }
 0x550   :  { %2112 = vmatpush3.bf16.msra.mxu0 %v2297_v6  ;;  %2133 = vmatprep.subr.bf16.mxu1 %v2188_v0 }
 0x551   :  { %2113 = vmatprep.subr.bf16.mxu0 %v2188_v0 }
 0x553   :  { %2134 = vmatpush3.bf16.msra.mxu1 %v2306_v7 }
 0x554   :  { %2114 = vmatpush3.bf16.msra.mxu0 %v2306_v7  ;;  %2135 = vmatprep.subr.bf16.mxu1 %v2188_v0 }
 0x555   :  { %2115 = vmatprep.subr.bf16.mxu0 %v2188_v0 }
 0x557   :  { %2136 = vmatpush3.bf16.msra.mxu1 %v2315_v8 }
 0x558   :  { %2116 = vmatpush3.bf16.msra.mxu0 %v2315_v8  ;;  %2146 = vmatprep.subr.mxu1 %v2188_v0 }
 0x559   :  { %2141 = vmatprep.subr.mxu0 %v2188_v0 }
 0x5f7   :  { %v992_v6 = vpop.f32.mrf.mxu0 }
 0x5f8   :  { %v996_v46 = vadd.f32 %v992_v6, %v915_v2 }
 0x5f9   :  { %v2085_v40 = vpop.f32.mrf.mxu0  ;;  %v1212_v7 = vpop.f32.mrf.mxu1 }
 0x5fb   :  { %v1139_v41 = vpop.f32.mrf.mxu0  ;;  %v2100_v42 = vpop.f32.mrf.mxu1 }
 0x5fc   :  { %v1140_v43 = vadd.f32 %v1139_v41, %v1066_v4 }
 0x5fd   :  { %v2095_v44 = vpop.f32.mrf.mxu0 }
 0x5fe   :  { %v1216_v45 = vadd.f32 %v1212_v7, %v1140_v43 }
 0x600   :  { %v1218_v47 = vrot.slane %v1216_v45, 4 }
 0x602   :  { %v1220_v8 = vsel %vm630_vm2, %v996_v46, %v1218_v47 }
 0x603   :  { %1221 = vadd.xlane.f32.xlu0 %v1220_v8  ;;  %v1223_v48 = vmul.f32 %v1220_v8, %v1220_v8 }
 0x605   :  { %1224 = vadd.xlane.f32.xlu1 %v1223_v48 }
 0x68c   :  { %v1222_v49 = vpop.xlane.xlu0 %1221 }
 0x68d   :  { %v1227_v50 = vrot.slane %v1222_v49, 4 }
 0x68e   :  { %v1225_v51 = vpop.xlane.xlu1 %1224 }
 0x68f   :  { %v1229_v52 = vadd.f32 %v1227_v50, %v1222_v49  ;;  %v1231_v53 = vrot.slane %v1225_v51, 4 }
 0x691   :  { %v1234_v54 = vmul.f32 0.00390625, %v1229_v52  ;;  %v1233_v55 = vadd.f32 %v1231_v53, %v1225_v51 }
 0x693   :  { %v1236_v56 = vmul.f32 %v1234_v54, %v1234_v54  ;;  %v1235_v57 = vmul.f32 0.00390625, %v1233_v55 }
 0x695   :  { %v1237_v58 = vsub.f32 %v1235_v57, %v1236_v56 }
 0x697   :  { %v1238_v59 = vmax.f32 %v1237_v58, 0.0 }
 0x699   :  { %v1240_v60 = vadd.f32 1e-05, %v1238_v59 }
 0x69b   :  { %2186 = vrsqrt.f32 %v1240_v60 }
 0x6a8   :  { %v2187_v62 = vpop.eup %2186 }
 0x6a9   :  { %v1242_v9 = vmul.f32 %v2187_v62, %v1239_v61 }
 0x6ab   :  { %v1247_v11 = vrot.slane %v1242_v9, 4  ;;  %v1244_v13 = vmul.f32 %v1242_v9, %v1234_v54 }
 0x6ad   :  { %v1249_v14 = vsel %vm630_vm2, %v1242_v9, %v1247_v11  ;;  %v1245_v15 = vsub.f32 %v1243_v10, %v1244_v13 }
 0x6ae   :  { %1256 = vperm.xlu0 %2175, %v1249_v14  }
 0x6af   :  { %v1251_v17 = vrot.slane %v1245_v15, 4 }
 0x6b1   :  { %v1253_v18 = vsel %vm630_vm2, %v1245_v15, %v1251_v17 }
 0x6b2   :  { %1817 = vperm.xlu0 %2175, %v1814_v16   ;;  %1262 = vperm.xlu1 %2174, %v1253_v18  }
 0x729   :  { %v1257_v19 = vpop.permute.xlu0 %1256 }
 0x72a   :  { %v1259_v20 = vmul.f32 %v1257_v19, %v1220_v8 }
 0x72d   :  { %v1263_v21 = vpop.permute.xlu1 %1262  ;;  %v1818_v50 = vpop.permute.xlu0 %1817 }
 0x72e   :  { %v1265_v22 = vadd.f32 %v1263_v21, %v1259_v20 }
 0x730   :  { %v1266_v23 = vmax.f32 %v1265_v22, 0.0 }
 0x732   :  { %v1267_v24 = vpack.c.bf16 %v1266_v23, %v1266_v23  ;;  %v1658_v39 = vrot.slane %v1266_v23, 4 }
 0x734   :  { %2118 = vmatmul.mubr.bf16.vlgmr.msra.gmra.mxu0 %v1267_v24 }
 0x735   :  { %2143 = vmatprep.mubr.msk.f32.mxu0 %vm2189_vm0, %v2188_v0 }
 0x7f4   :  { %v1302_v25 = vpop.f32.mrf.mxu0 }
 0x7f5   :  { %v1308_v26 = vpack.c.bf16 %v1302_v25, %v1302_v25  ;;  %2142 = vmatpush3.msk.msra.mxu0 %vm630_vm2, %v1302_v25  ;;  %v1585_v31 = vrot.slane %v1302_v25, 4 }
 0x7f6   :  { %v2119_v27 = vpop.f32.mrf.mxu0  ;;  %2151 = vmatprep.subr.mxu0 %v2188_v0  ;;  %2144 = vmatmul.mubr.msk.f32.vlgmr.msra.gmra.mxu0 %vm765_vm3, %v1857_v32 }
 0x7f7   :  { %2138 = vmatmul.mubr.bf16.vlgmr.msra.gmra.mxu1 %v1308_v26  ;;  %2153 = vmatprep.mubr.msk.f32.mxu0 %vm2189_vm0, %v2188_v0 }
 0x7f8   :  { %2147 = vmatpush3.msk.msra.mxu1 %vm630_vm2, %v1266_v23  ;;  %v1305_v28 = vpop.f32.mrf.mxu0  ;;  %2148 = vmatprep.mubr.msk.f32.mxu1 %vm2189_vm0, %v2188_v0 }
 0x7f9   :  { %2156 = vmatprep.subr.mxu1 %v2188_v0 }
 0x7fa   :  { %v2120_v29 = vpop.f32.mrf.mxu0 }
 0x7ff   :  { %2149 = vmatmul.mubr.msk.f32.vlgmr.msra.gmra.mxu1 %vm765_vm3, %v1351_v30 }
 0x800   :  { %2157 = vmatpush3.msk.msra.mxu1 %vm630_vm2, %v1585_v31  ;;  %2158 = vmatprep.mubr.msk.f32.mxu1 %vm2189_vm0, %v2188_v0 }
 0x801   :  { %2166 = vmatprep.subr.mxu1 %v2188_v0 }
 0x803   :  { %2159 = vmatmul.mubr.msk.f32.vlgmr.msra.gmra.mxu1 %vm765_vm3, %v1857_v32 }
 0x804   :  { %2168 = vmatprep.mubr.msk.f32.mxu1 %vm2189_vm0, %v2188_v0 }
 0x8b6   :  { %v1426_v5 = vpop.f32.mrf.mxu0 }
 0x8b7   :  { %v1343_v33 = vpop.f32.mrf.mxu1 }
 0x8b8   :  { %v1349_v34 = vmul.f32 2.0, %v1343_v33  ;;  %v2145_v40 = vpop.f32.mrf.mxu0 }
 0x8b9   :  { %v2139_v35 = vpop.f32.mrf.mxu1 }
 0x8ba   :  { %v1350_v36 = vsub.f32 %v1349_v34, %v1266_v23 }
 0x8bb   :  { %v1346_v38 = vpop.f32.mrf.mxu1 }
 0x8bc   :  { %v1731_v1 = vrot.slane %v1350_v36, 4  ;;  %2152 = vmatpush3.msk.msra.mxu0 %vm630_vm2, %v1350_v36 }
 0x8bd   :  { %v2140_v2 = vpop.f32.mrf.mxu1  ;;  %2154 = vmatmul.mubr.msk.f32.vlgmr.msra.gmra.mxu0 %vm765_vm3, %v1862_v37  ;;  %2161 = vmatprep.subr.mxu0 %v2188_v0 }
 0x8be   :  { %2162 = vmatpush3.msk.msra.mxu0 %vm630_vm2, %v1658_v39  ;;  %2167 = vmatpush3.msk.msra.mxu1 %vm630_vm2, %v1731_v1 }
 0x8bf   :  { %2163 = vmatprep.mubr.msk.f32.mxu0 %vm2189_vm0, %v2188_v0  ;;  %2169 = vmatmul.mubr.msk.f32.vlgmr.msra.gmra.mxu1 %vm765_vm3, %v1862_v37  ;;  %v1502_v3 = vpop.f32.mrf.mxu1 }
 0x8c0   :  { %v1503_v6 = vadd.f32 %v1502_v3, %v1426_v5 }
 0x8c1   :  { %2164 = vmatmul.mubr.msk.f32.vlgmr.msra.gmra.mxu0 %vm765_vm3, %v1351_v30  ;;  %v2150_v4 = vpop.f32.mrf.mxu1 }
 0x8c3   :  { %v1654_v7 = vpop.f32.mrf.mxu1 }
 0x8c5   :  { %v2160_v41 = vpop.f32.mrf.mxu1 }
 0x97d   :  { %v1580_v42 = vpop.f32.mrf.mxu0 }
 0x97e   :  { %v1584_v0 = vadd.f32 %v1580_v42, %v1503_v6 }
 0x97f   :  { %v2155_v43 = vpop.f32.mrf.mxu0  ;;  %v1800_v44 = vpop.f32.mrf.mxu1 }
 0x981   :  { %v1727_v45 = vpop.f32.mrf.mxu0  ;;  %v2170_v46 = vpop.f32.mrf.mxu1 }
 0x982   :  { %v1728_v47 = vadd.f32 %v1727_v45, %v1654_v7 }
 0x983   :  { %v2165_v8 = vpop.f32.mrf.mxu0 }
 0x984   :  { %v1804_v48 = vadd.f32 %v1800_v44, %v1728_v47 }
 0x986   :  { %v1806_v49 = vrot.slane %v1804_v48, 5 }
 0x988   :  { %v1809_v51 = vsel %vm1808_vm4, %v1584_v0, %v1806_v49 }
 0x989   :  { %v1820_v52 = vadd.f32 %v1818_v50, %v1809_v51 }
 0x98b   :  { %v1821_v53 = vmax.f32 %v1820_v52, 0.0 }
 0x98d   :  { %1822 = vst [vmem:[%s2547_s10] sm:$0x3f] %v1821_v53 }

</bundles_post_ra>
